<compile_context>
chip_gen: v7x
topology: tpu7x:2x2x1
jax: 0.10.0
libtpu: 0.0.40
codegen_flags: <defaults>
</compile_context>

<pallas_src>
import functools
import math

import jax
import jax.numpy as jnp
from jax.experimental import pallas as pl
from jax.experimental.pallas import tpu as pltpu


def _round_up(x, m):
    return (x + m - 1) // m * m


def _gelu_exact(x):
    # matches torch.nn.GELU() (erf-based, approximate='none')
    return 0.5 * x * (1.0 + jax.lax.erf(x * (1.0 / math.sqrt(2.0))))


def residual_block_kernel(x_ref, w1_ref, b1_ref, w2_ref, b2_ref, br_ref,
                          out_ref, p_ref, hid_ref,
                          *, Nb, H, W, KH, KW, cin_p, chid_p, cout_p,
                          wpp, head, lhid_img):
    Wp = W + 2                      # padded row width (pad=1 each side)
    HWP = H * Wp                    # real flattened output positions per image
    K1 = KH * KW * cin_p
    K2 = KH * KW * chid_p

    # Per-image lane validity: keep only real rows (flat < H*Wp) and real cols (col < W).
    flat = jax.lax.broadcasted_iota(jnp.int32, (1, wpp), 1)
    valid = jnp.logical_and(flat % Wp < W, flat < HWP)

    # ---- conv1 (+ folded 1x1 residual): one bf16 MXU matmul over im2col patches -----------
    for nb in range(Nb):
        for kh in range(KH):
            for kw in range(KW):
                t = kh * KW + kw
                off = kh * Wp + kw                                    # static lane offset
                p_ref[t * cin_p:(t + 1) * cin_p, nb * wpp:(nb + 1) * wpp] = \
                    x_ref[nb, :, off:off + wpp]
    y1r = jax.lax.dot_general(w1_ref[...], p_ref[:K1, :],
                              dimension_numbers=(((1,), (0,)), ((), ())),
                              preferred_element_type=jnp.float32)     # (chid_p+cout_p, Nb*wpp)

    for nb in range(Nb):
        lo, hi = nb * wpp, (nb + 1) * wpp
        y1 = _gelu_exact(y1r[:chid_p, lo:hi] + b1_ref[...])
        y1 = jnp.where(valid, y1, 0.0)        # junk lanes become conv2's left/right/bottom pad
        base = nb * lhid_img
        # zero borders (top/bottom pad for conv2) + interior store; interior fully overwritten
        hid_ref[:, base:base + head] = jnp.zeros((chid_p, head), dtype=hid_ref.dtype)
        hid_ref[:, base + head + wpp:base + lhid_img] = \
            jnp.zeros((chid_p, head), dtype=hid_ref.dtype)
        hid_ref[:, base + head:base + head + wpp] = y1.astype(hid_ref.dtype)
        # residual branch (centre-tap rows of the same matmul): stash in the resident out block
        out_ref[nb] = (y1r[chid_p:chid_p + cout_p, lo:hi] + br_ref[...]).astype(out_ref.dtype)

    # ---- conv2: same im2col trick, reusing the shared patch scratch ------------------------
    for nb in range(Nb):
        base = nb * lhid_img + head
        for kh in range(KH):
            for kw in range(KW):
                t = kh * KW + kw
                off = base + (kh - 1) * Wp + (kw - 1)
                p_ref[t * chid_p:(t + 1) * chid_p, nb * wpp:(nb + 1) * wpp] = \
                    hid_ref[:, off:off + wpp]
    y2r = jax.lax.dot_general(w2_ref[...], p_ref[:K2, :],
                              dimension_numbers=(((1,), (0,)), ((), ())),
                              preferred_element_type=jnp.float32)     # (cout_p, Nb*wpp)

    for nb in range(Nb):
        lo, hi = nb * wpp, (nb + 1) * wpp
        y2 = _gelu_exact(y2r[:, lo:hi] + b2_ref[...])
        out_ref[nb] = (out_ref[nb] + y2).astype(out_ref.dtype)


def residual_block(x_nchw, params, *, nb_images=None):
    """x_nchw: (N, Cin, H, W) f32. Returns (N, Cout, H, W). 3x3 convs, stride 1, padding 1."""
    w1, b1, w2, b2, wr, br = params
    N, Cin, H, W = x_nchw.shape
    KH, KW, _, Chid = w1.shape
    Cout = w2.shape[-1]
    assert (KH, KW) == (3, 3), "kernel assumes kernel_size=3 with padding=1 (as in the module)"

    # channel pads to multiples of 16 (bf16 sublane packing)
    cin_p = _round_up(Cin, 16)
    chid_p = _round_up(Chid, 16)
    cout_p = _round_up(Cout, 16)

    Wp = W + 2
    HWP = H * Wp
    WPP = _round_up(HWP, 128)                  # per-image lane width -> dense stores
    HEAD = _round_up(Wp + 1, 128)              # zero-border width inside the hidden scratch
    LHID_IMG = HEAD + WPP + HEAD
    LPAD = _round_up(2 * Wp + 2 + WPP, 128)    # flattened padded input length per image
    K1 = KH * KW * cin_p
    K2 = KH * KW * chid_p
    K_max = max(K1, K2)

    # batch folding: widen the matmul RHS lane dimension to ~>=512 lanes per grid step
    if nb_images is None:
        nb_images = min(N, max(1, -(-512 // WPP)))
    Nb = max(1, nb_images)
    N_pad = _round_up(N, Nb)

    # Input: NCHW kept (no transpose). Pad batch/channels, spatial top=1,left=1,right=1,
    # flatten spatial, then zero-pad the flat axis so all tap slices stay in range.
    x_pad = jnp.pad(x_nchw, ((0, N_pad - N), (0, cin_p - Cin), (1, 0), (1, 1)))
    x_flat = x_pad.reshape(N_pad, cin_p, (H + 1) * Wp)
    x_flat = jnp.pad(x_flat, ((0, 0), (0, 0), (0, LPAD - (H + 1) * Wp))).astype(jnp.bfloat16)

    # Weights -> (out, K) matmul form in (kh, kw, cin) K order; bf16 MXU operands.
    w1m = jnp.transpose(
        jnp.pad(w1, ((0, 0), (0, 0), (0, cin_p - Cin), (0, chid_p - Chid))),
        (3, 0, 1, 2)).reshape(chid_p, K1)
    # Fold the 1x1 residual conv into conv1's matmul: extra cout_p output rows that are
    # non-zero only in the centre-tap (kh=1, kw=1) K block.
    wrm = jnp.pad(wr, ((0, cin_p - Cin), (0, cout_p - Cout))).T         # (cout_p, cin_p)
    ctr = (1 * KW + 1) * cin_p
    wres = jnp.zeros((cout_p, K1), jnp.float32).at[:, ctr:ctr + cin_p].set(wrm)
    w1e = jnp.concatenate([w1m, wres], axis=0).astype(jnp.bfloat16)     # (chid_p+cout_p, K1)

    w2m = jnp.transpose(
        jnp.pad(w2, ((0, 0), (0, 0), (0, chid_p - Chid), (0, cout_p - Cout))),
        (3, 0, 1, 2)).reshape(cout_p, K2).astype(jnp.bfloat16)
    b1c = jnp.pad(b1, (0, chid_p - Chid)).reshape(chid_p, 1)            # biases stay f32
    b2c = jnp.pad(b2, (0, cout_p - Cout)).reshape(cout_p, 1)
    brc = jnp.pad(br, (0, cout_p - Cout)).reshape(cout_p, 1)

    kernel = functools.partial(
        residual_block_kernel, Nb=Nb, H=H, W=W, KH=KH, KW=KW,
        cin_p=cin_p, chid_p=chid_p, cout_p=cout_p,
        wpp=WPP, head=HEAD, lhid_img=LHID_IMG)

    lanes = Nb * WPP
    out_grid = pl.pallas_call(
        kernel,
        out_shape=jax.ShapeDtypeStruct((N_pad, cout_p, WPP), x_nchw.dtype),
        grid_spec=pltpu.PrefetchScalarGridSpec(
            num_scalar_prefetch=0,
            grid=(N_pad // Nb,),
            in_specs=[
                pl.BlockSpec((Nb, cin_p, LPAD), lambda g: (g, 0, 0)),
                pl.BlockSpec((chid_p + cout_p, K1), lambda g: (0, 0)),
                pl.BlockSpec((chid_p, 1), lambda g: (0, 0)),
                pl.BlockSpec((cout_p, K2), lambda g: (0, 0)),
                pl.BlockSpec((cout_p, 1), lambda g: (0, 0)),
                pl.BlockSpec((cout_p, 1), lambda g: (0, 0)),
            ],
            out_specs=pl.BlockSpec((Nb, cout_p, WPP), lambda g: (g, 0, 0)),
            scratch_shapes=[
                pltpu.VMEM((K_max, lanes), jnp.bfloat16),             # shared im2col patches
                pltpu.VMEM((chid_p, Nb * LHID_IMG), jnp.bfloat16),    # zero-bordered hidden
            ],
        ),
        # batch axis carries no accumulator -> shard across TensorCores on v7x.
        compiler_params=pltpu.CompilerParams(
            dimension_semantics=("parallel",),
            vmem_limit_bytes=32 * 1024 * 1024),
    )(x_flat, w1e, b1c, w2m, b2c, brc)

    # Drop lane padding / junk columns / channel padding / batch padding.
    out = out_grid[:, :, :HWP].reshape(N_pad, cout_p, H, Wp)
    return out[:N, :Cout, :, :W]


def _reference(x_nchw, params):
    """Pure-JAX f32 reference matching the PyTorch module."""
    w1, b1, w2, b2, wr, br = params
    x = jnp.transpose(x_nchw, (0, 2, 3, 1))
    dn = ("NHWC", "HWIO", "NHWC")

    def conv(inp, w, b, pad):
        o = jax.lax.conv_general_dilated(inp, w, (1, 1), [(pad, pad), (pad, pad)],
                                         dimension_numbers=dn)
        return o + b[None, None, None, :]

    h = jax.nn.gelu(conv(x, w1, b1, 1), approximate=False)
    y = jax.nn.gelu(conv(h, w2, b2, 1), approximate=False)
    r = conv(x, wr.reshape(1, 1, *wr.shape), br, 0)
    return jnp.transpose(y + r, (0, 3, 1, 2))


def init_params(key, in_channels, hidden_channels, out_channels, kh=3, kw=3):
    ks = jax.random.split(key, 6)
    scale = 0.1
    w1 = scale * jax.random.normal(ks[0], (kh, kw, in_channels, hidden_channels), jnp.float32)
    b1 = scale * jax.random.normal(ks[1], (hidden_channels,), jnp.float32)
    w2 = scale * jax.random.normal(ks[2], (kh, kw, hidden_channels, out_channels), jnp.float32)
    b2 = scale * jax.random.normal(ks[3], (out_channels,), jnp.float32)
    wr = scale * jax.random.normal(ks[4], (in_channels, out_channels), jnp.float32)
    br = scale * jax.random.normal(ks[5], (out_channels,), jnp.float32)
    return (w1, b1, w2, b2, wr, br)


if __name__ == "__main__":
    key = jax.random.PRNGKey(0)
    k_x, k_p = jax.random.split(key)

    N, Cin, H, W = 2, 4, 16, 16
    Chid, Cout = 8, 4

    x = jax.random.normal(k_x, (N, Cin, H, W), jnp.float32)
    params = init_params(k_p, Cin, Chid, Cout)

    out = jax.block_until_ready(residual_block(x, params))
    ref = jax.block_until_ready(_reference(x, params))

    assert out.shape == (N, Cout, H, W)
    err = float(jnp.max(jnp.abs(out - ref)))
    # bf16 MXU operands vs f32 reference -> loosened tolerance
    assert jnp.allclose(out, ref, atol=2e-2, rtol=2e-2), f"mismatch vs reference, max|diff|={err}"

    print("KERNEL_OK")
</pallas_src>

<mosaic_0001>
module attributes {stable_mosaic.version = 11 : i64} {
  func.func @residual_block_kernel(%arg0: i32, %arg1: memref<2x16x512xbf16, #tpu.memory_space<vmem>>, %arg2: memref<32x144xbf16, #tpu.memory_space<vmem>>, %arg3: memref<16x1xf32, #tpu.memory_space<vmem>>, %arg4: memref<16x144xbf16, #tpu.memory_space<vmem>>, %arg5: memref<16x1xf32, #tpu.memory_space<vmem>>, %arg6: memref<16x1xf32, #tpu.memory_space<vmem>>, %arg7: memref<2x16x384xf32, #tpu.memory_space<vmem>>, %arg8: memref<144x768xbf16, #tpu.memory_space<vmem>>, %arg9: memref<16x1280xbf16, #tpu.memory_space<vmem>>) attributes {dimension_semantics = [#tpu.dimension_semantics<parallel>], iteration_bounds = array<i64: 1>, scalar_prefetch = 0 : i64, scratch_operands = 2 : i64, tpu.core_type = #tpu.core_type<tc>, window_params = [{transform_indices = @transform_0, window_bounds = array<i64: 2, 16, 512>}, {pipeline_mode = #tpu.pipeline_mode<synchronous>, transform_indices = @transform_1, window_bounds = array<i64: 32, 144>}, {pipeline_mode = #tpu.pipeline_mode<synchronous>, transform_indices = @transform_2, window_bounds = array<i64: 16, 1>}, {pipeline_mode = #tpu.pipeline_mode<synchronous>, transform_indices = @transform_3, window_bounds = array<i64: 16, 144>}, {pipeline_mode = #tpu.pipeline_mode<synchronous>, transform_indices = @transform_4, window_bounds = array<i64: 16, 1>}, {pipeline_mode = #tpu.pipeline_mode<synchronous>, transform_indices = @transform_5, window_bounds = array<i64: 16, 1>}, {transform_indices = @transform_6, window_bounds = array<i64: 2, 16, 384>}]} {
    %0 = tpu.iota {dimensions = array<i32: 1>} : vector<1x384xi32>
    %c18_i32 = arith.constant 18 : i32
    %c0_i32 = arith.constant 0 : i32
    %1 = arith.cmpi eq, %c18_i32, %c0_i32 : i32
    %c1_i32 = arith.constant 1 : i32
    %2 = arith.select %1, %c1_i32, %c18_i32 : i32
    %3 = vector.broadcast %2 : i32 to vector<1x384xi32>
    %4 = arith.remsi %0, %3 : vector<1x384xi32>
    %c0_i32_0 = arith.constant 0 : i32
    %5 = vector.broadcast %c0_i32_0 : i32 to vector<1x384xi32>
    %6 = arith.cmpi ne, %4, %5 : vector<1x384xi32>
    %c0_i32_1 = arith.constant 0 : i32
    %7 = vector.broadcast %c0_i32_1 : i32 to vector<1x384xi32>
    %8 = arith.cmpi slt, %4, %7 : vector<1x384xi32>
    %c0_i32_2 = arith.constant 0 : i32
    %9 = arith.cmpi slt, %2, %c0_i32_2 : i32
    %10 = vector.broadcast %9 : i1 to vector<1x384xi1>
    %11 = vector.broadcast %10 : vector<1x384xi1> to vector<1x384xi1>
    %12 = arith.xori %8, %11 : vector<1x384xi1>
    %13 = arith.andi %12, %6 : vector<1x384xi1>
    %14 = vector.broadcast %2 : i32 to vector<1x384xi32>
    %15 = arith.addi %4, %14 : vector<1x384xi32>
    %16 = arith.select %13, %15, %4 : vector<1x384xi1>, vector<1x384xi32>
    %c16_i32 = arith.constant 16 : i32
    %17 = vector.broadcast %c16_i32 : i32 to vector<1x384xi32>
    %18 = arith.cmpi slt, %16, %17 : vector<1x384xi32>
    %c288_i32 = arith.constant 288 : i32
    %19 = vector.broadcast %c288_i32 : i32 to vector<1x384xi32>
    %20 = arith.cmpi slt, %0, %19 : vector<1x384xi32>
    %21 = arith.andi %18, %20 : vector<1x384xi1>
    %c0 = arith.constant 0 : index
    %c0_3 = arith.constant 0 : index
    %c0_4 = arith.constant 0 : index
    %22 = vector.load %arg1[%c0, %c0_3, %c0_4] : memref<2x16x512xbf16, #tpu.memory_space<vmem>>, vector<1x16x384xbf16>
    %23 = vector.shape_cast %22 : vector<1x16x384xbf16> to vector<16x384xbf16>
    %c0_5 = arith.constant 0 : index
    %c0_6 = arith.constant 0 : index
    %24 = vector.load %arg8[%c0_5, %c0_6] : memref<144x768xbf16, #tpu.memory_space<vmem>>, vector<16x384xbf16>
    tpu.vector_store %arg8[%c0_5, %c0_6], %23 {strides = array<i32>} : memref<144x768xbf16, #tpu.memory_space<vmem>>, vector<16x384xbf16>,
    %c0_7 = arith.constant 0 : index
    %c0_8 = arith.constant 0 : index
    %c1 = arith.constant 1 : index
    %25 = vector.load %arg1[%c0_7, %c0_8, %c1] : memref<2x16x512xbf16, #tpu.memory_space<vmem>>, vector<1x16x384xbf16>
    %26 = vector.shape_cast %25 : vector<1x16x384xbf16> to vector<16x384xbf16>
    %c16 = arith.constant 16 : index
    %c0_9 = arith.constant 0 : index
    %27 = vector.load %arg8[%c16, %c0_9] : memref<144x768xbf16, #tpu.memory_space<vmem>>, vector<16x384xbf16>
    tpu.vector_store %arg8[%c16, %c0_9], %26 {strides = array<i32>} : memref<144x768xbf16, #tpu.memory_space<vmem>>, vector<16x384xbf16>,
    %c0_10 = arith.constant 0 : index
    %c0_11 = arith.constant 0 : index
    %c2 = arith.constant 2 : index
    %28 = vector.load %arg1[%c0_10, %c0_11, %c2] : memref<2x16x512xbf16, #tpu.memory_space<vmem>>, vector<1x16x384xbf16>
    %29 = vector.shape_cast %28 : vector<1x16x384xbf16> to vector<16x384xbf16>
    %c32 = arith.constant 32 : index
    %c0_12 = arith.constant 0 : index
    %30 = vector.load %arg8[%c32, %c0_12] : memref<144x768xbf16, #tpu.memory_space<vmem>>, vector<16x384xbf16>
    tpu.vector_store %arg8[%c32, %c0_12], %29 {strides = array<i32>} : memref<144x768xbf16, #tpu.memory_space<vmem>>, vector<16x384xbf16>,
    %c0_13 = arith.constant 0 : index
    %c0_14 = arith.constant 0 : index
    %c18 = arith.constant 18 : index
    %31 = vector.load %arg1[%c0_13, %c0_14, %c18] : memref<2x16x512xbf16, #tpu.memory_space<vmem>>, vector<1x16x384xbf16>
    %32 = vector.shape_cast %31 : vector<1x16x384xbf16> to vector<16x384xbf16>
    %c48 = arith.constant 48 : index
    %c0_15 = arith.constant 0 : index
    %33 = vector.load %arg8[%c48, %c0_15] : memref<144x768xbf16, #tpu.memory_space<vmem>>, vector<16x384xbf16>
    tpu.vector_store %arg8[%c48, %c0_15], %32 {strides = array<i32>} : memref<144x768xbf16, #tpu.memory_space<vmem>>, vector<16x384xbf16>,
    %c0_16 = arith.constant 0 : index
    %c0_17 = arith.constant 0 : index
    %c19 = arith.constant 19 : index
    %34 = vector.load %arg1[%c0_16, %c0_17, %c19] : memref<2x16x512xbf16, #tpu.memory_space<vmem>>, vector<1x16x384xbf16>
    %35 = vector.shape_cast %34 : vector<1x16x384xbf16> to vector<16x384xbf16>
    %c64 = arith.constant 64 : index
    %c0_18 = arith.constant 0 : index
    %36 = vector.load %arg8[%c64, %c0_18] : memref<144x768xbf16, #tpu.memory_space<vmem>>, vector<16x384xbf16>
    tpu.vector_store %arg8[%c64, %c0_18], %35 {strides = array<i32>} : memref<144x768xbf16, #tpu.memory_space<vmem>>, vector<16x384xbf16>,
    %c0_19 = arith.constant 0 : index
    %c0_20 = arith.constant 0 : index
    %c20 = arith.constant 20 : index
    %37 = vector.load %arg1[%c0_19, %c0_20, %c20] : memref<2x16x512xbf16, #tpu.memory_space<vmem>>, vector<1x16x384xbf16>
    %38 = vector.shape_cast %37 : vector<1x16x384xbf16> to vector<16x384xbf16>
    %c80 = arith.constant 80 : index
    %c0_21 = arith.constant 0 : index
    %39 = vector.load %arg8[%c80, %c0_21] : memref<144x768xbf16, #tpu.memory_space<vmem>>, vector<16x384xbf16>
    tpu.vector_store %arg8[%c80, %c0_21], %38 {strides = array<i32>} : memref<144x768xbf16, #tpu.memory_space<vmem>>, vector<16x384xbf16>,
    %c0_22 = arith.constant 0 : index
    %c0_23 = arith.constant 0 : index
    %c36 = arith.constant 36 : index
    %40 = vector.load %arg1[%c0_22, %c0_23, %c36] : memref<2x16x512xbf16, #tpu.memory_space<vmem>>, vector<1x16x384xbf16>
    %41 = vector.shape_cast %40 : vector<1x16x384xbf16> to vector<16x384xbf16>
    %c96 = arith.constant 96 : index
    %c0_24 = arith.constant 0 : index
    %42 = vector.load %arg8[%c96, %c0_24] : memref<144x768xbf16, #tpu.memory_space<vmem>>, vector<16x384xbf16>
    tpu.vector_store %arg8[%c96, %c0_24], %41 {strides = array<i32>} : memref<144x768xbf16, #tpu.memory_space<vmem>>, vector<16x384xbf16>,
    %c0_25 = arith.constant 0 : index
    %c0_26 = arith.constant 0 : index
    %c37 = arith.constant 37 : index
    %43 = vector.load %arg1[%c0_25, %c0_26, %c37] : memref<2x16x512xbf16, #tpu.memory_space<vmem>>, vector<1x16x384xbf16>
    %44 = vector.shape_cast %43 : vector<1x16x384xbf16> to vector<16x384xbf16>
    %c112 = arith.constant 112 : index
    %c0_27 = arith.constant 0 : index
    %45 = vector.load %arg8[%c112, %c0_27] : memref<144x768xbf16, #tpu.memory_space<vmem>>, vector<16x384xbf16>
    tpu.vector_store %arg8[%c112, %c0_27], %44 {strides = array<i32>} : memref<144x768xbf16, #tpu.memory_space<vmem>>, vector<16x384xbf16>,
    %c0_28 = arith.constant 0 : index
    %c0_29 = arith.constant 0 : index
    %c38 = arith.constant 38 : index
    %46 = vector.load %arg1[%c0_28, %c0_29, %c38] : memref<2x16x512xbf16, #tpu.memory_space<vmem>>, vector<1x16x384xbf16>
    %47 = vector.shape_cast %46 : vector<1x16x384xbf16> to vector<16x384xbf16>
    %c128 = arith.constant 128 : index
    %c0_30 = arith.constant 0 : index
    %48 = vector.load %arg8[%c128, %c0_30] : memref<144x768xbf16, #tpu.memory_space<vmem>>, vector<16x384xbf16>
    tpu.vector_store %arg8[%c128, %c0_30], %47 {strides = array<i32>} : memref<144x768xbf16, #tpu.memory_space<vmem>>, vector<16x384xbf16>,
    %c1_31 = arith.constant 1 : index
    %c0_32 = arith.constant 0 : index
    %c0_33 = arith.constant 0 : index
    %49 = vector.load %arg1[%c1_31, %c0_32, %c0_33] : memref<2x16x512xbf16, #tpu.memory_space<vmem>>, vector<1x16x384xbf16>
    %50 = vector.shape_cast %49 : vector<1x16x384xbf16> to vector<16x384xbf16>
    %c0_34 = arith.constant 0 : index
    %c384 = arith.constant 384 : index
    %51 = vector.load %arg8[%c0_34, %c384] : memref<144x768xbf16, #tpu.memory_space<vmem>>, vector<16x384xbf16>
    tpu.vector_store %arg8[%c0_34, %c384], %50 {strides = array<i32>} : memref<144x768xbf16, #tpu.memory_space<vmem>>, vector<16x384xbf16>,
    %c1_35 = arith.constant 1 : index
    %c0_36 = arith.constant 0 : index
    %c1_37 = arith.constant 1 : index
    %52 = vector.load %arg1[%c1_35, %c0_36, %c1_37] : memref<2x16x512xbf16, #tpu.memory_space<vmem>>, vector<1x16x384xbf16>
    %53 = vector.shape_cast %52 : vector<1x16x384xbf16> to vector<16x384xbf16>
    %c16_38 = arith.constant 16 : index
    %c384_39 = arith.constant 384 : index
    %54 = vector.load %arg8[%c16_38, %c384_39] : memref<144x768xbf16, #tpu.memory_space<vmem>>, vector<16x384xbf16>
    tpu.vector_store %arg8[%c16_38, %c384_39], %53 {strides = array<i32>} : memref<144x768xbf16, #tpu.memory_space<vmem>>, vector<16x384xbf16>,
    %c1_40 = arith.constant 1 : index
    %c0_41 = arith.constant 0 : index
    %c2_42 = arith.constant 2 : index
    %55 = vector.load %arg1[%c1_40, %c0_41, %c2_42] : memref<2x16x512xbf16, #tpu.memory_space<vmem>>, vector<1x16x384xbf16>
    %56 = vector.shape_cast %55 : vector<1x16x384xbf16> to vector<16x384xbf16>
    %c32_43 = arith.constant 32 : index
    %c384_44 = arith.constant 384 : index
    %57 = vector.load %arg8[%c32_43, %c384_44] : memref<144x768xbf16, #tpu.memory_space<vmem>>, vector<16x384xbf16>
    tpu.vector_store %arg8[%c32_43, %c384_44], %56 {strides = array<i32>} : memref<144x768xbf16, #tpu.memory_space<vmem>>, vector<16x384xbf16>,
    %c1_45 = arith.constant 1 : index
    %c0_46 = arith.constant 0 : index
    %c18_47 = arith.constant 18 : index
    %58 = vector.load %arg1[%c1_45, %c0_46, %c18_47] : memref<2x16x512xbf16, #tpu.memory_space<vmem>>, vector<1x16x384xbf16>
    %59 = vector.shape_cast %58 : vector<1x16x384xbf16> to vector<16x384xbf16>
    %c48_48 = arith.constant 48 : index
    %c384_49 = arith.constant 384 : index
    %60 = vector.load %arg8[%c48_48, %c384_49] : memref<144x768xbf16, #tpu.memory_space<vmem>>, vector<16x384xbf16>
    tpu.vector_store %arg8[%c48_48, %c384_49], %59 {strides = array<i32>} : memref<144x768xbf16, #tpu.memory_space<vmem>>, vector<16x384xbf16>,
    %c1_50 = arith.constant 1 : index
    %c0_51 = arith.constant 0 : index
    %c19_52 = arith.constant 19 : index
    %61 = vector.load %arg1[%c1_50, %c0_51, %c19_52] : memref<2x16x512xbf16, #tpu.memory_space<vmem>>, vector<1x16x384xbf16>
    %62 = vector.shape_cast %61 : vector<1x16x384xbf16> to vector<16x384xbf16>
    %c64_53 = arith.constant 64 : index
    %c384_54 = arith.constant 384 : index
    %63 = vector.load %arg8[%c64_53, %c384_54] : memref<144x768xbf16, #tpu.memory_space<vmem>>, vector<16x384xbf16>
    tpu.vector_store %arg8[%c64_53, %c384_54], %62 {strides = array<i32>} : memref<144x768xbf16, #tpu.memory_space<vmem>>, vector<16x384xbf16>,
    %c1_55 = arith.constant 1 : index
    %c0_56 = arith.constant 0 : index
    %c20_57 = arith.constant 20 : index
    %64 = vector.load %arg1[%c1_55, %c0_56, %c20_57] : memref<2x16x512xbf16, #tpu.memory_space<vmem>>, vector<1x16x384xbf16>
    %65 = vector.shape_cast %64 : vector<1x16x384xbf16> to vector<16x384xbf16>
    %c80_58 = arith.constant 80 : index
    %c384_59 = arith.constant 384 : index
    %66 = vector.load %arg8[%c80_58, %c384_59] : memref<144x768xbf16, #tpu.memory_space<vmem>>, vector<16x384xbf16>
    tpu.vector_store %arg8[%c80_58, %c384_59], %65 {strides = array<i32>} : memref<144x768xbf16, #tpu.memory_space<vmem>>, vector<16x384xbf16>,
    %c1_60 = arith.constant 1 : index
    %c0_61 = arith.constant 0 : index
    %c36_62 = arith.constant 36 : index
    %67 = vector.load %arg1[%c1_60, %c0_61, %c36_62] : memref<2x16x512xbf16, #tpu.memory_space<vmem>>, vector<1x16x384xbf16>
    %68 = vector.shape_cast %67 : vector<1x16x384xbf16> to vector<16x384xbf16>
    %c96_63 = arith.constant 96 : index
    %c384_64 = arith.constant 384 : index
    %69 = vector.load %arg8[%c96_63, %c384_64] : memref<144x768xbf16, #tpu.memory_space<vmem>>, vector<16x384xbf16>
    tpu.vector_store %arg8[%c96_63, %c384_64], %68 {strides = array<i32>} : memref<144x768xbf16, #tpu.memory_space<vmem>>, vector<16x384xbf16>,
    %c1_65 = arith.constant 1 : index
    %c0_66 = arith.constant 0 : index
    %c37_67 = arith.constant 37 : index
    %70 = vector.load %arg1[%c1_65, %c0_66, %c37_67] : memref<2x16x512xbf16, #tpu.memory_space<vmem>>, vector<1x16x384xbf16>
    %71 = vector.shape_cast %70 : vector<1x16x384xbf16> to vector<16x384xbf16>
    %c112_68 = arith.constant 112 : index
    %c384_69 = arith.constant 384 : index
    %72 = vector.load %arg8[%c112_68, %c384_69] : memref<144x768xbf16, #tpu.memory_space<vmem>>, vector<16x384xbf16>
    tpu.vector_store %arg8[%c112_68, %c384_69], %71 {strides = array<i32>} : memref<144x768xbf16, #tpu.memory_space<vmem>>, vector<16x384xbf16>,
    %c1_70 = arith.constant 1 : index
    %c0_71 = arith.constant 0 : index
    %c38_72 = arith.constant 38 : index
    %73 = vector.load %arg1[%c1_70, %c0_71, %c38_72] : memref<2x16x512xbf16, #tpu.memory_space<vmem>>, vector<1x16x384xbf16>
    %74 = vector.shape_cast %73 : vector<1x16x384xbf16> to vector<16x384xbf16>
    %c128_73 = arith.constant 128 : index
    %c384_74 = arith.constant 384 : index
    %75 = vector.load %arg8[%c128_73, %c384_74] : memref<144x768xbf16, #tpu.memory_space<vmem>>, vector<16x384xbf16>
    tpu.vector_store %arg8[%c128_73, %c384_74], %74 {strides = array<i32>} : memref<144x768xbf16, #tpu.memory_space<vmem>>, vector<16x384xbf16>,
    %c0_75 = arith.constant 0 : index
    %c0_76 = arith.constant 0 : index
    %76 = vector.load %arg2[%c0_75, %c0_76] : memref<32x144xbf16, #tpu.memory_space<vmem>>, vector<32x144xbf16>
    %c0_77 = arith.constant 0 : index
    %c0_78 = arith.constant 0 : index
    %77 = vector.load %arg8[%c0_77, %c0_78] : memref<144x768xbf16, #tpu.memory_space<vmem>>, vector<144x768xbf16>
    %cst = arith.constant dense<0.000000e+00> : vector<32x768xf32>
    %78 = tpu.matmul %76, %77, %cst {dimension_numbers = #tpu.dot_dimension_numbers<[1], [0], [0], [1], [0, 0, 1, 1], [], []>} : vector<32x144xbf16>, vector<144x768xbf16>, vector<32x768xf32> -> vector<32x768xf32>
    %79 = vector.extract_strided_slice %78 {offsets = [0, 0], sizes = [16, 384], strides = [1, 1]} : vector<32x768xf32> to vector<16x384xf32>
    %c0_79 = arith.constant 0 : index
    %c0_80 = arith.constant 0 : index
    %80 = vector.load %arg3[%c0_79, %c0_80] : memref<16x1xf32, #tpu.memory_space<vmem>>, vector<16x1xf32>
    %81 = vector.broadcast %80 : vector<16x1xf32> to vector<16x384xf32>
    %82 = arith.addf %79, %81 : vector<16x384xf32>
    %cst_81 = arith.constant 5.000000e-01 : f32
    %83 = vector.broadcast %cst_81 : f32 to vector<16x384xf32>
    %84 = arith.mulf %83, %82 : vector<16x384xf32>
    %cst_82 = arith.constant 0.707106769 : f32
    %85 = vector.broadcast %cst_82 : f32 to vector<16x384xf32>
    %86 = arith.mulf %82, %85 : vector<16x384xf32>
    %87 = math.erf %86 : vector<16x384xf32>
    %cst_83 = arith.constant 1.000000e+00 : f32
    %88 = vector.broadcast %cst_83 : f32 to vector<16x384xf32>
    %89 = arith.addf %88, %87 : vector<16x384xf32>
    %90 = arith.mulf %84, %89 : vector<16x384xf32>
    %cst_84 = arith.constant 0.000000e+00 : f32
    %91 = vector.shape_cast %21 : vector<1x384xi1> to vector<1x384xi1>
    %92 = vector.broadcast %91 : vector<1x384xi1> to vector<16x384xi1>
    %93 = vector.broadcast %cst_84 : f32 to vector<16x384xf32>
    %94 = arith.select %92, %90, %93 : vector<16x384xi1>, vector<16x384xf32>
    %cst_85 = arith.constant 0.000000e+00 : bf16
    %95 = vector.broadcast %cst_85 : bf16 to vector<16x128xbf16>
    %c0_86 = arith.constant 0 : index
    %c0_87 = arith.constant 0 : index
    %96 = vector.load %arg9[%c0_86, %c0_87] : memref<16x1280xbf16, #tpu.memory_space<vmem>>, vector<16x128xbf16>
    tpu.vector_store %arg9[%c0_86, %c0_87], %95 {strides = array<i32>} : memref<16x1280xbf16, #tpu.memory_space<vmem>>, vector<16x128xbf16>,
    %cst_88 = arith.constant 0.000000e+00 : bf16
    %97 = vector.broadcast %cst_88 : bf16 to vector<16x128xbf16>
    %c0_89 = arith.constant 0 : index
    %c512 = arith.constant 512 : index
    %98 = vector.load %arg9[%c0_89, %c512] : memref<16x1280xbf16, #tpu.memory_space<vmem>>, vector<16x128xbf16>
    tpu.vector_store %arg9[%c0_89, %c512], %97 {strides = array<i32>} : memref<16x1280xbf16, #tpu.memory_space<vmem>>, vector<16x128xbf16>,
    %99 = arith.truncf %94 : vector<16x384xf32> to vector<16x384xbf16>
    %c0_90 = arith.constant 0 : index
    %c128_91 = arith.constant 128 : index
    %100 = vector.load %arg9[%c0_90, %c128_91] : memref<16x1280xbf16, #tpu.memory_space<vmem>>, vector<16x384xbf16>
    tpu.vector_store %arg9[%c0_90, %c128_91], %99 {strides = array<i32>} : memref<16x1280xbf16, #tpu.memory_space<vmem>>, vector<16x384xbf16>,
    %101 = vector.extract_strided_slice %78 {offsets = [16, 0], sizes = [16, 384], strides = [1, 1]} : vector<32x768xf32> to vector<16x384xf32>
    %c0_92 = arith.constant 0 : index
    %c0_93 = arith.constant 0 : index
    %102 = vector.load %arg6[%c0_92, %c0_93] : memref<16x1xf32, #tpu.memory_space<vmem>>, vector<16x1xf32>
    %103 = vector.broadcast %102 : vector<16x1xf32> to vector<16x384xf32>
    %104 = arith.addf %101, %103 : vector<16x384xf32>
    %c0_94 = arith.constant 0 : index
    %c0_95 = arith.constant 0 : index
    %c0_96 = arith.constant 0 : index
    %105 = vector.load %arg7[%c0_94, %c0_95, %c0_96] : memref<2x16x384xf32, #tpu.memory_space<vmem>>, vector<1x16x384xf32>
    %106 = vector.shape_cast %105 : vector<1x16x384xf32> to vector<16x384xf32>
    %107 = vector.shape_cast %104 : vector<16x384xf32> to vector<1x16x384xf32>
    tpu.vector_store %arg7[%c0_94, %c0_95, %c0_96], %107 {strides = array<i32>} : memref<2x16x384xf32, #tpu.memory_space<vmem>>, vector<1x16x384xf32>,
    %108 = vector.extract_strided_slice %78 {offsets = [0, 384], sizes = [16, 384], strides = [1, 1]} : vector<32x768xf32> to vector<16x384xf32>
    %c0_97 = arith.constant 0 : index
    %c0_98 = arith.constant 0 : index
    %109 = vector.load %arg3[%c0_97, %c0_98] : memref<16x1xf32, #tpu.memory_space<vmem>>, vector<16x1xf32>
    %110 = vector.broadcast %109 : vector<16x1xf32> to vector<16x384xf32>
    %111 = arith.addf %108, %110 : vector<16x384xf32>
    %cst_99 = arith.constant 5.000000e-01 : f32
    %112 = vector.broadcast %cst_99 : f32 to vector<16x384xf32>
    %113 = arith.mulf %112, %111 : vector<16x384xf32>
    %cst_100 = arith.constant 0.707106769 : f32
    %114 = vector.broadcast %cst_100 : f32 to vector<16x384xf32>
    %115 = arith.mulf %111, %114 : vector<16x384xf32>
    %116 = math.erf %115 : vector<16x384xf32>
    %cst_101 = arith.constant 1.000000e+00 : f32
    %117 = vector.broadcast %cst_101 : f32 to vector<16x384xf32>
    %118 = arith.addf %117, %116 : vector<16x384xf32>
    %119 = arith.mulf %113, %118 : vector<16x384xf32>
    %cst_102 = arith.constant 0.000000e+00 : f32
    %120 = vector.shape_cast %21 : vector<1x384xi1> to vector<1x384xi1>
    %121 = vector.broadcast %120 : vector<1x384xi1> to vector<16x384xi1>
    %122 = vector.broadcast %cst_102 : f32 to vector<16x384xf32>
    %123 = arith.select %121, %119, %122 : vector<16x384xi1>, vector<16x384xf32>
    %cst_103 = arith.constant 0.000000e+00 : bf16
    %124 = vector.broadcast %cst_103 : bf16 to vector<16x128xbf16>
    %c0_104 = arith.constant 0 : index
    %c640 = arith.constant 640 : index
    %125 = vector.load %arg9[%c0_104, %c640] : memref<16x1280xbf16, #tpu.memory_space<vmem>>, vector<16x128xbf16>
    tpu.vector_store %arg9[%c0_104, %c640], %124 {strides = array<i32>} : memref<16x1280xbf16, #tpu.memory_space<vmem>>, vector<16x128xbf16>,
    %cst_105 = arith.constant 0.000000e+00 : bf16
    %126 = vector.broadcast %cst_105 : bf16 to vector<16x128xbf16>
    %c0_106 = arith.constant 0 : index
    %c1152 = arith.constant 1152 : index
    %127 = vector.load %arg9[%c0_106, %c1152] : memref<16x1280xbf16, #tpu.memory_space<vmem>>, vector<16x128xbf16>
    tpu.vector_store %arg9[%c0_106, %c1152], %126 {strides = array<i32>} : memref<16x1280xbf16, #tpu.memory_space<vmem>>, vector<16x128xbf16>,
    %128 = arith.truncf %123 : vector<16x384xf32> to vector<16x384xbf16>
    %c0_107 = arith.constant 0 : index
    %c768 = arith.constant 768 : index
    %129 = vector.load %arg9[%c0_107, %c768] : memref<16x1280xbf16, #tpu.memory_space<vmem>>, vector<16x384xbf16>
    tpu.vector_store %arg9[%c0_107, %c768], %128 {strides = array<i32>} : memref<16x1280xbf16, #tpu.memory_space<vmem>>, vector<16x384xbf16>,
    %130 = vector.extract_strided_slice %78 {offsets = [16, 384], sizes = [16, 384], strides = [1, 1]} : vector<32x768xf32> to vector<16x384xf32>
    %c0_108 = arith.constant 0 : index
    %c0_109 = arith.constant 0 : index
    %131 = vector.load %arg6[%c0_108, %c0_109] : memref<16x1xf32, #tpu.memory_space<vmem>>, vector<16x1xf32>
    %132 = vector.broadcast %131 : vector<16x1xf32> to vector<16x384xf32>
    %133 = arith.addf %130, %132 : vector<16x384xf32>
    %c1_110 = arith.constant 1 : index
    %c0_111 = arith.constant 0 : index
    %c0_112 = arith.constant 0 : index
    %134 = vector.load %arg7[%c1_110, %c0_111, %c0_112] : memref<2x16x384xf32, #tpu.memory_space<vmem>>, vector<1x16x384xf32>
    %135 = vector.shape_cast %134 : vector<1x16x384xf32> to vector<16x384xf32>
    %136 = vector.shape_cast %133 : vector<16x384xf32> to vector<1x16x384xf32>
    tpu.vector_store %arg7[%c1_110, %c0_111, %c0_112], %136 {strides = array<i32>} : memref<2x16x384xf32, #tpu.memory_space<vmem>>, vector<1x16x384xf32>,
    %c0_113 = arith.constant 0 : index
    %c109 = arith.constant 109 : index
    %137 = vector.load %arg9[%c0_113, %c109] : memref<16x1280xbf16, #tpu.memory_space<vmem>>, vector<16x384xbf16>
    %c0_114 = arith.constant 0 : index
    %c0_115 = arith.constant 0 : index
    %138 = vector.load %arg8[%c0_114, %c0_115] : memref<144x768xbf16, #tpu.memory_space<vmem>>, vector<16x384xbf16>
    tpu.vector_store %arg8[%c0_114, %c0_115], %137 {strides = array<i32>} : memref<144x768xbf16, #tpu.memory_space<vmem>>, vector<16x384xbf16>,
    %c0_116 = arith.constant 0 : index
    %c110 = arith.constant 110 : index
    %139 = vector.load %arg9[%c0_116, %c110] : memref<16x1280xbf16, #tpu.memory_space<vmem>>, vector<16x384xbf16>
    %c16_117 = arith.constant 16 : index
    %c0_118 = arith.constant 0 : index
    %140 = vector.load %arg8[%c16_117, %c0_118] : memref<144x768xbf16, #tpu.memory_space<vmem>>, vector<16x384xbf16>
    tpu.vector_store %arg8[%c16_117, %c0_118], %139 {strides = array<i32>} : memref<144x768xbf16, #tpu.memory_space<vmem>>, vector<16x384xbf16>,
    %c0_119 = arith.constant 0 : index
    %c111 = arith.constant 111 : index
    %141 = vector.load %arg9[%c0_119, %c111] : memref<16x1280xbf16, #tpu.memory_space<vmem>>, vector<16x384xbf16>
    %c32_120 = arith.constant 32 : index
    %c0_121 = arith.constant 0 : index
    %142 = vector.load %arg8[%c32_120, %c0_121] : memref<144x768xbf16, #tpu.memory_space<vmem>>, vector<16x384xbf16>
    tpu.vector_store %arg8[%c32_120, %c0_121], %141 {strides = array<i32>} : memref<144x768xbf16, #tpu.memory_space<vmem>>, vector<16x384xbf16>,
    %c0_122 = arith.constant 0 : index
    %c127 = arith.constant 127 : index
    %143 = vector.load %arg9[%c0_122, %c127] : memref<16x1280xbf16, #tpu.memory_space<vmem>>, vector<16x384xbf16>
    %c48_123 = arith.constant 48 : index
    %c0_124 = arith.constant 0 : index
    %144 = vector.load %arg8[%c48_123, %c0_124] : memref<144x768xbf16, #tpu.memory_space<vmem>>, vector<16x384xbf16>
    tpu.vector_store %arg8[%c48_123, %c0_124], %143 {strides = array<i32>} : memref<144x768xbf16, #tpu.memory_space<vmem>>, vector<16x384xbf16>,
    %c0_125 = arith.constant 0 : index
    %c128_126 = arith.constant 128 : index
    %145 = vector.load %arg9[%c0_125, %c128_126] : memref<16x1280xbf16, #tpu.memory_space<vmem>>, vector<16x384xbf16>
    %c64_127 = arith.constant 64 : index
    %c0_128 = arith.constant 0 : index
    %146 = vector.load %arg8[%c64_127, %c0_128] : memref<144x768xbf16, #tpu.memory_space<vmem>>, vector<16x384xbf16>
    tpu.vector_store %arg8[%c64_127, %c0_128], %145 {strides = array<i32>} : memref<144x768xbf16, #tpu.memory_space<vmem>>, vector<16x384xbf16>,
    %c0_129 = arith.constant 0 : index
    %c129 = arith.constant 129 : index
    %147 = vector.load %arg9[%c0_129, %c129] : memref<16x1280xbf16, #tpu.memory_space<vmem>>, vector<16x384xbf16>
    %c80_130 = arith.constant 80 : index
    %c0_131 = arith.constant 0 : index
    %148 = vector.load %arg8[%c80_130, %c0_131] : memref<144x768xbf16, #tpu.memory_space<vmem>>, vector<16x384xbf16>
    tpu.vector_store %arg8[%c80_130, %c0_131], %147 {strides = array<i32>} : memref<144x768xbf16, #tpu.memory_space<vmem>>, vector<16x384xbf16>,
    %c0_132 = arith.constant 0 : index
    %c145 = arith.constant 145 : index
    %149 = vector.load %arg9[%c0_132, %c145] : memref<16x1280xbf16, #tpu.memory_space<vmem>>, vector<16x384xbf16>
    %c96_133 = arith.constant 96 : index
    %c0_134 = arith.constant 0 : index
    %150 = vector.load %arg8[%c96_133, %c0_134] : memref<144x768xbf16, #tpu.memory_space<vmem>>, vector<16x384xbf16>
    tpu.vector_store %arg8[%c96_133, %c0_134], %149 {strides = array<i32>} : memref<144x768xbf16, #tpu.memory_space<vmem>>, vector<16x384xbf16>,
    %c0_135 = arith.constant 0 : index
    %c146 = arith.constant 146 : index
    %151 = vector.load %arg9[%c0_135, %c146] : memref<16x1280xbf16, #tpu.memory_space<vmem>>, vector<16x384xbf16>
    %c112_136 = arith.constant 112 : index
    %c0_137 = arith.constant 0 : index
    %152 = vector.load %arg8[%c112_136, %c0_137] : memref<144x768xbf16, #tpu.memory_space<vmem>>, vector<16x384xbf16>
    tpu.vector_store %arg8[%c112_136, %c0_137], %151 {strides = array<i32>} : memref<144x768xbf16, #tpu.memory_space<vmem>>, vector<16x384xbf16>,
    %c0_138 = arith.constant 0 : index
    %c147 = arith.constant 147 : index
    %153 = vector.load %arg9[%c0_138, %c147] : memref<16x1280xbf16, #tpu.memory_space<vmem>>, vector<16x384xbf16>
    %c128_139 = arith.constant 128 : index
    %c0_140 = arith.constant 0 : index
    %154 = vector.load %arg8[%c128_139, %c0_140] : memref<144x768xbf16, #tpu.memory_space<vmem>>, vector<16x384xbf16>
    tpu.vector_store %arg8[%c128_139, %c0_140], %153 {strides = array<i32>} : memref<144x768xbf16, #tpu.memory_space<vmem>>, vector<16x384xbf16>,
    %c0_141 = arith.constant 0 : index
    %c749 = arith.constant 749 : index
    %155 = vector.load %arg9[%c0_141, %c749] : memref<16x1280xbf16, #tpu.memory_space<vmem>>, vector<16x384xbf16>
    %c0_142 = arith.constant 0 : index
    %c384_143 = arith.constant 384 : index
    %156 = vector.load %arg8[%c0_142, %c384_143] : memref<144x768xbf16, #tpu.memory_space<vmem>>, vector<16x384xbf16>
    tpu.vector_store %arg8[%c0_142, %c384_143], %155 {strides = array<i32>} : memref<144x768xbf16, #tpu.memory_space<vmem>>, vector<16x384xbf16>,
    %c0_144 = arith.constant 0 : index
    %c750 = arith.constant 750 : index
    %157 = vector.load %arg9[%c0_144, %c750] : memref<16x1280xbf16, #tpu.memory_space<vmem>>, vector<16x384xbf16>
    %c16_145 = arith.constant 16 : index
    %c384_146 = arith.constant 384 : index
    %158 = vector.load %arg8[%c16_145, %c384_146] : memref<144x768xbf16, #tpu.memory_space<vmem>>, vector<16x384xbf16>
    tpu.vector_store %arg8[%c16_145, %c384_146], %157 {strides = array<i32>} : memref<144x768xbf16, #tpu.memory_space<vmem>>, vector<16x384xbf16>,
    %c0_147 = arith.constant 0 : index
    %c751 = arith.constant 751 : index
    %159 = vector.load %arg9[%c0_147, %c751] : memref<16x1280xbf16, #tpu.memory_space<vmem>>, vector<16x384xbf16>
    %c32_148 = arith.constant 32 : index
    %c384_149 = arith.constant 384 : index
    %160 = vector.load %arg8[%c32_148, %c384_149] : memref<144x768xbf16, #tpu.memory_space<vmem>>, vector<16x384xbf16>
    tpu.vector_store %arg8[%c32_148, %c384_149], %159 {strides = array<i32>} : memref<144x768xbf16, #tpu.memory_space<vmem>>, vector<16x384xbf16>,
    %c0_150 = arith.constant 0 : index
    %c767 = arith.constant 767 : index
    %161 = vector.load %arg9[%c0_150, %c767] : memref<16x1280xbf16, #tpu.memory_space<vmem>>, vector<16x384xbf16>
    %c48_151 = arith.constant 48 : index
    %c384_152 = arith.constant 384 : index
    %162 = vector.load %arg8[%c48_151, %c384_152] : memref<144x768xbf16, #tpu.memory_space<vmem>>, vector<16x384xbf16>
    tpu.vector_store %arg8[%c48_151, %c384_152], %161 {strides = array<i32>} : memref<144x768xbf16, #tpu.memory_space<vmem>>, vector<16x384xbf16>,
    %c0_153 = arith.constant 0 : index
    %c768_154 = arith.constant 768 : index
    %163 = vector.load %arg9[%c0_153, %c768_154] : memref<16x1280xbf16, #tpu.memory_space<vmem>>, vector<16x384xbf16>
    %c64_155 = arith.constant 64 : index
    %c384_156 = arith.constant 384 : index
    %164 = vector.load %arg8[%c64_155, %c384_156] : memref<144x768xbf16, #tpu.memory_space<vmem>>, vector<16x384xbf16>
    tpu.vector_store %arg8[%c64_155, %c384_156], %163 {strides = array<i32>} : memref<144x768xbf16, #tpu.memory_space<vmem>>, vector<16x384xbf16>,
    %c0_157 = arith.constant 0 : index
    %c769 = arith.constant 769 : index
    %165 = vector.load %arg9[%c0_157, %c769] : memref<16x1280xbf16, #tpu.memory_space<vmem>>, vector<16x384xbf16>
    %c80_158 = arith.constant 80 : index
    %c384_159 = arith.constant 384 : index
    %166 = vector.load %arg8[%c80_158, %c384_159] : memref<144x768xbf16, #tpu.memory_space<vmem>>, vector<16x384xbf16>
    tpu.vector_store %arg8[%c80_158, %c384_159], %165 {strides = array<i32>} : memref<144x768xbf16, #tpu.memory_space<vmem>>, vector<16x384xbf16>,
    %c0_160 = arith.constant 0 : index
    %c785 = arith.constant 785 : index
    %167 = vector.load %arg9[%c0_160, %c785] : memref<16x1280xbf16, #tpu.memory_space<vmem>>, vector<16x384xbf16>
    %c96_161 = arith.constant 96 : index
    %c384_162 = arith.constant 384 : index
    %168 = vector.load %arg8[%c96_161, %c384_162] : memref<144x768xbf16, #tpu.memory_space<vmem>>, vector<16x384xbf16>
    tpu.vector_store %arg8[%c96_161, %c384_162], %167 {strides = array<i32>} : memref<144x768xbf16, #tpu.memory_space<vmem>>, vector<16x384xbf16>,
    %c0_163 = arith.constant 0 : index
    %c786 = arith.constant 786 : index
    %169 = vector.load %arg9[%c0_163, %c786] : memref<16x1280xbf16, #tpu.memory_space<vmem>>, vector<16x384xbf16>
    %c112_164 = arith.constant 112 : index
    %c384_165 = arith.constant 384 : index
    %170 = vector.load %arg8[%c112_164, %c384_165] : memref<144x768xbf16, #tpu.memory_space<vmem>>, vector<16x384xbf16>
    tpu.vector_store %arg8[%c112_164, %c384_165], %169 {strides = array<i32>} : memref<144x768xbf16, #tpu.memory_space<vmem>>, vector<16x384xbf16>,
    %c0_166 = arith.constant 0 : index
    %c787 = arith.constant 787 : index
    %171 = vector.load %arg9[%c0_166, %c787] : memref<16x1280xbf16, #tpu.memory_space<vmem>>, vector<16x384xbf16>
    %c128_167 = arith.constant 128 : index
    %c384_168 = arith.constant 384 : index
    %172 = vector.load %arg8[%c128_167, %c384_168] : memref<144x768xbf16, #tpu.memory_space<vmem>>, vector<16x384xbf16>
    tpu.vector_store %arg8[%c128_167, %c384_168], %171 {strides = array<i32>} : memref<144x768xbf16, #tpu.memory_space<vmem>>, vector<16x384xbf16>,
    %c0_169 = arith.constant 0 : index
    %c0_170 = arith.constant 0 : index
    %173 = vector.load %arg4[%c0_169, %c0_170] : memref<16x144xbf16, #tpu.memory_space<vmem>>, vector<16x144xbf16>
    %c0_171 = arith.constant 0 : index
    %c0_172 = arith.constant 0 : index
    %174 = vector.load %arg8[%c0_171, %c0_172] : memref<144x768xbf16, #tpu.memory_space<vmem>>, vector<144x768xbf16>
    %cst_173 = arith.constant dense<0.000000e+00> : vector<16x768xf32>
    %175 = tpu.matmul %173, %174, %cst_173 {dimension_numbers = #tpu.dot_dimension_numbers<[1], [0], [0], [1], [0, 0, 1, 1], [], []>} : vector<16x144xbf16>, vector<144x768xbf16>, vector<16x768xf32> -> vector<16x768xf32>
    %176 = vector.extract_strided_slice %175 {offsets = [0, 0], sizes = [16, 384], strides = [1, 1]} : vector<16x768xf32> to vector<16x384xf32>
    %c0_174 = arith.constant 0 : index
    %c0_175 = arith.constant 0 : index
    %177 = vector.load %arg5[%c0_174, %c0_175] : memref<16x1xf32, #tpu.memory_space<vmem>>, vector<16x1xf32>
    %178 = vector.broadcast %177 : vector<16x1xf32> to vector<16x384xf32>
    %179 = arith.addf %176, %178 : vector<16x384xf32>
    %cst_176 = arith.constant 5.000000e-01 : f32
    %180 = vector.broadcast %cst_176 : f32 to vector<16x384xf32>
    %181 = arith.mulf %180, %179 : vector<16x384xf32>
    %cst_177 = arith.constant 0.707106769 : f32
    %182 = vector.broadcast %cst_177 : f32 to vector<16x384xf32>
    %183 = arith.mulf %179, %182 : vector<16x384xf32>
    %184 = math.erf %183 : vector<16x384xf32>
    %cst_178 = arith.constant 1.000000e+00 : f32
    %185 = vector.broadcast %cst_178 : f32 to vector<16x384xf32>
    %186 = arith.addf %185, %184 : vector<16x384xf32>
    %187 = arith.mulf %181, %186 : vector<16x384xf32>
    %c0_179 = arith.constant 0 : index
    %c0_180 = arith.constant 0 : index
    %c0_181 = arith.constant 0 : index
    %188 = vector.load %arg7[%c0_179, %c0_180, %c0_181] : memref<2x16x384xf32, #tpu.memory_space<vmem>>, vector<1x16x384xf32>
    %189 = vector.shape_cast %188 : vector<1x16x384xf32> to vector<16x384xf32>
    %190 = arith.addf %189, %187 : vector<16x384xf32>
    %c0_182 = arith.constant 0 : index
    %c0_183 = arith.constant 0 : index
    %c0_184 = arith.constant 0 : index
    %191 = vector.load %arg7[%c0_182, %c0_183, %c0_184] : memref<2x16x384xf32, #tpu.memory_space<vmem>>, vector<1x16x384xf32>
    %192 = vector.shape_cast %191 : vector<1x16x384xf32> to vector<16x384xf32>
    %193 = vector.shape_cast %190 : vector<16x384xf32> to vector<1x16x384xf32>
    tpu.vector_store %arg7[%c0_182, %c0_183, %c0_184], %193 {strides = array<i32>} : memref<2x16x384xf32, #tpu.memory_space<vmem>>, vector<1x16x384xf32>,
    %194 = vector.extract_strided_slice %175 {offsets = [0, 384], sizes = [16, 384], strides = [1, 1]} : vector<16x768xf32> to vector<16x384xf32>
    %c0_185 = arith.constant 0 : index
    %c0_186 = arith.constant 0 : index
    %195 = vector.load %arg5[%c0_185, %c0_186] : memref<16x1xf32, #tpu.memory_space<vmem>>, vector<16x1xf32>
    %196 = vector.broadcast %195 : vector<16x1xf32> to vector<16x384xf32>
    %197 = arith.addf %194, %196 : vector<16x384xf32>
    %cst_187 = arith.constant 5.000000e-01 : f32
    %198 = vector.broadcast %cst_187 : f32 to vector<16x384xf32>
    %199 = arith.mulf %198, %197 : vector<16x384xf32>
    %cst_188 = arith.constant 0.707106769 : f32
    %200 = vector.broadcast %cst_188 : f32 to vector<16x384xf32>
    %201 = arith.mulf %197, %200 : vector<16x384xf32>
    %202 = math.erf %201 : vector<16x384xf32>
    %cst_189 = arith.constant 1.000000e+00 : f32
    %203 = vector.broadcast %cst_189 : f32 to vector<16x384xf32>
    %204 = arith.addf %203, %202 : vector<16x384xf32>
    %205 = arith.mulf %199, %204 : vector<16x384xf32>
    %c1_190 = arith.constant 1 : index
    %c0_191 = arith.constant 0 : index
    %c0_192 = arith.constant 0 : index
    %206 = vector.load %arg7[%c1_190, %c0_191, %c0_192] : memref<2x16x384xf32, #tpu.memory_space<vmem>>, vector<1x16x384xf32>
    %207 = vector.shape_cast %206 : vector<1x16x384xf32> to vector<16x384xf32>
    %208 = arith.addf %207, %205 : vector<16x384xf32>
    %c1_193 = arith.constant 1 : index
    %c0_194 = arith.constant 0 : index
    %c0_195 = arith.constant 0 : index
    %209 = vector.load %arg7[%c1_193, %c0_194, %c0_195] : memref<2x16x384xf32, #tpu.memory_space<vmem>>, vector<1x16x384xf32>
    %210 = vector.shape_cast %209 : vector<1x16x384xf32> to vector<16x384xf32>
    %211 = vector.shape_cast %208 : vector<16x384xf32> to vector<1x16x384xf32>
    tpu.vector_store %arg7[%c1_193, %c0_194, %c0_195], %211 {strides = array<i32>} : memref<2x16x384xf32, #tpu.memory_space<vmem>>, vector<1x16x384xf32>,
    return
  }
  func.func @transform_0(%arg0: i32) -> (i32, i32, i32) {
    %c0_i32 = arith.constant 0 : i32
    %c0_i32_0 = arith.constant 0 : i32
    %c0_i32_1 = arith.constant 0 : i32
    return %arg0, %c0_i32, %c0_i32_0 : i32, i32, i32
  }
  func.func @transform_1(%arg0: i32) -> (i32, i32) {
    %c0_i32 = arith.constant 0 : i32
    %c0_i32_0 = arith.constant 0 : i32
    %c0_i32_1 = arith.constant 0 : i32
    return %c0_i32, %c0_i32_0 : i32, i32
  }
  func.func @transform_2(%arg0: i32) -> (i32, i32) {
    %c0_i32 = arith.constant 0 : i32
    %c0_i32_0 = arith.constant 0 : i32
    %c0_i32_1 = arith.constant 0 : i32
    return %c0_i32, %c0_i32_0 : i32, i32
  }
  func.func @transform_3(%arg0: i32) -> (i32, i32) {
    %c0_i32 = arith.constant 0 : i32
    %c0_i32_0 = arith.constant 0 : i32
    %c0_i32_1 = arith.constant 0 : i32
    return %c0_i32, %c0_i32_0 : i32, i32
  }
  func.func @transform_4(%arg0: i32) -> (i32, i32) {
    %c0_i32 = arith.constant 0 : i32
    %c0_i32_0 = arith.constant 0 : i32
    %c0_i32_1 = arith.constant 0 : i32
    return %c0_i32, %c0_i32_0 : i32, i32
  }
  func.func @transform_5(%arg0: i32) -> (i32, i32) {
    %c0_i32 = arith.constant 0 : i32
    %c0_i32_0 = arith.constant 0 : i32
    %c0_i32_1 = arith.constant 0 : i32
    return %c0_i32, %c0_i32_0 : i32, i32
  }
  func.func @transform_6(%arg0: i32) -> (i32, i32, i32) {
    %c0_i32 = arith.constant 0 : i32
    %c0_i32_0 = arith.constant 0 : i32
    %c0_i32_1 = arith.constant 0 : i32
    return %arg0, %c0_i32, %c0_i32_0 : i32, i32, i32
  }
}

</mosaic_0001>

<bundles_post_ra>
// kernel: tpu_custom_call.1
= control target key start
LH: loop header
LB: loop body
LE: loop exit
PB: predicated region body
PF: predicated region fallthrough
CT: control target
= control target key end

     0   :  { %11 = vsyncpa [#allocation5], 0  ;;  %s2966_s0 = inlined_call_operand.hbm [shape: bf16[2,16,512], index: 0, kind: input, shape index: {}]   ;;  %s2967_s1 = inlined_call_operand.vmem [shape: bf16[32,144], index: 1, kind: input, shape index: {}]   ;;  %s2968_s2 = inlined_call_operand.vmem [shape: f32[16,1], index: 2, kind: input, shape index: {}]   ;;  %s2969_s3 = inlined_call_operand.vmem [shape: bf16[16,144], index: 3, kind: input, shape index: {}]   ;;  %s2970_s4 = inlined_call_operand.vmem [shape: f32[16,1], index: 4, kind: input, shape index: {}]   ;;  %s2971_s5 = inlined_call_operand.vmem [shape: f32[16,1], index: 5, kind: input, shape index: {}]   ;;  %s2972_s6 = inlined_call_operand.hbm [shape: f32[2,16,384], index: 6, kind: output, shape index: {}]  }
   0x1   :  { %12 = vsyncpa [#allocation6], 0  ;;  %s2211_s21 = smov [#allocation4]   ;;  %s2163_s25 = scalar_lea.hbm %s2966_s0, 1024 }
   0x2   :  { %s18_s22 = sshll.u32 %s2211_s21, 4  ;;  %p2164_p0 = scmp.ne.s32.totalorder %s2966_s0, %s2163_s25  ;;  %s19_s22 = int_to_ptr.vmem [resolvable:$true] %s18_s22 }
   0x3   :  { %p2167_p1 = scmp.lt.u32.totalorder %s2163_s25, %s2966_s0 }
   0x5   :  { %p2169_p2 = pnand %p2167_p1, %p2164_p0 }
   0x7   :  { %2172 = shalt.err (!%p2169_p2)
}
   0x8   :  { %s2173_s30 = scalar_lea.vmem %s19_s22, 1024  ;;  %p2178_p4 = scmp.lt.s32.totalorder %s19_s22, %s19_s22 }
   0x9   :  { %p2174_p3 = scmp.ne.s32.totalorder %s19_s22, %s2173_s30  ;;  %p2179_p5 = scmp.lt.s32.totalorder %s2173_s30, %s2173_s30 }
   0xb   :  { %p2180_p6 = por %p2179_p5, %p2178_p4 }
   0xd   :  { %p2181_p7 = pnand %p2180_p6, %p2174_p3 }
   0xf   :  { %2184 = shalt.err (!%p2181_p7)
}
  0x10   :  { %s2212_s7 = smov 256   ;;  %s2213_s8 = smov 16  }
  0x11   :  { %24 = dma.hbm_to_vmem [thread:$0]  %s2966_s0, 1024, %s19_s22, [#allocation5], %s2212_s7, %s2212_s7, %s2213_s8  }
  0x12   :  { %2207 = dma.done.wait [#allocation5], 1024  }
  0x13   :  { %2208 = vsyncadd [#allocation5], 4294966272  ;;  %v2092_v0 = vld [vmem:[#allocation4 + $0x4] ss:$16 sps:$4 sm:$0xff]   ;;  %v2094_v1 = vld [vmem:[#allocation4] ss:$16 sps:$4 sm:$0xff]  }
  0x14   :  { %s2214_s11 = smov 127   ;;  %v2095_v2 = vld [vmem:[#allocation4 + $0x8] ss:$16 sps:$4 sm:$0xff]   ;;  %830 = vmatprep.subr.bf16.mxu0 %v2092_v0  ;;  %v2280_v3 = vld [vmem:[#allocation4 + $0x20] ss:$16 sps:$4 sm:$0xff]   ;;  %s2215_s12 = smov 126  }
  0x15   :  { %145 = vrot.lane.b32.xlu0 %v2092_v0, %s2214_s11  ;;  %143 = vrot.lane.b32.xlu1 %v2094_v1, %s2214_s11  ;;  %s2216_s0 = smov 110   ;;  %s2217_s13 = smov 109   ;;  %v2104_v4 = vld [vmem:[#allocation4 + $0x8] ss:$16 sps:$4 sm:$0xff]   ;;  %v2299_v5 = vld [vmem:[#allocation4 + $0x24] ss:$16 sps:$4 sm:$0xff]  }
  0x16   :  { %831 = vmatpush1.bf16.msra.mxu0 %v2094_v1  ;;  %883 = vmatprep.subr.bf16.mxu1 %v2280_v3  ;;  %s2218_s14 = smov 108   ;;  %s2219_s15 = smov 92   ;;  %v2100_v6 = vld [vmem:[#allocation4 + $0xc] ss:$16 sps:$4 sm:$0xff]   ;;  %vm823_vm0 = vcmask 130048   ;;  %vm151_vm1 = vcmask 1039360  }
  0x17   :  { %884 = vmatpush1.bf16.msra.mxu1 %v2104_v4  ;;  %s2220_s16 = smov 91   ;;  %s2221_s17 = smov 90   ;;  %v2318_v7 = vld [vmem:[%s2967_s1 + $0x4] ss:$8 sps:$4 sm:$0xff]   ;;  %v2101_v8 = vld [vmem:[#allocation4 + $0x28] ss:$16 sps:$4 sm:$0xff]  }
  0x18   :  { %2005 = vmatprep.mubr.msk.bf16.mxu0 %vm823_vm0, %v2318_v7  ;;  %2007 = vmatprep.mubr.msk.bf16.mxu1 %vm823_vm0, %v2318_v7  ;;  %v2103_v9 = vld [vmem:[#allocation4 + $0x2c] ss:$16 sps:$4 sm:$0xff]   ;;  %v2222_v13 = vmov 0   ;;  %vm189_vm2 = vcmask 1031168   ;;  %vm227_vm3 = vcmask 900096   ;;  %v989_v21 = vld [vmem:[%s2968_s2] sm:$0xff] }
  0x19   :  { %147 = vrot.lane.b32.xlu0 %v2095_v2, %s2214_s11  ;;  %183 = vrot.lane.b32.xlu1 %v2092_v0, %s2215_s12  ;;  %v990_v23 = vld [vmem:[%s2968_s2 + $0x8] sm:$0xff]  ;;  %vm265_vm4 = vcmask 891904   ;;  %vm303_vm5 = vcmask 883712   ;;  %vm341_vm6 = vcmask 752640   ;;  %vm379_vm7 = vcmask 744448   ;;  %s2224_s29 = smov 18  }
  0x1a   :  { %2061 = vset.pattern.permute.xlu1 %v2222_v13  ;;  %2060 = vset.pattern.permute.xlu0 %v2222_v13  ;;  %vm417_vm8 = vcmask 736256   ;;  %v2107_v60 = vld [vmem:[#allocation4 + $0x28] ss:$16 sps:$4 sm:$0xff]   ;;  %s2225_s30 = smov 17   ;;  %s2226_s7 = smov 1  }
  0x1b   :  { %s2227_s8 = smov 111  }
  0x1d   :  { %185 = vrot.lane.b32.xlu0 %v2095_v2, %s2215_s12  ;;  %181 = vrot.lane.b32.xlu1 %v2094_v1, %s2215_s12 }
  0x21   :  { %221 = vrot.lane.b32.xlu0 %v2092_v0, %s2216_s0  ;;  %223 = vrot.lane.b32.xlu1 %v2095_v2, %s2216_s0 }
  0x25   :  { %219 = vrot.lane.b32.xlu0 %v2094_v1, %s2216_s0  ;;  %259 = vrot.lane.b32.xlu1 %v2092_v0, %s2217_s13 }
  0x29   :  { %261 = vrot.lane.b32.xlu0 %v2095_v2, %s2217_s13  ;;  %257 = vrot.lane.b32.xlu1 %v2094_v1, %s2217_s13 }
  0x2d   :  { %297 = vrot.lane.b32.xlu0 %v2092_v0, %s2218_s14  ;;  %299 = vrot.lane.b32.xlu1 %v2095_v2, %s2218_s14 }
  0x31   :  { %295 = vrot.lane.b32.xlu0 %v2094_v1, %s2218_s14  ;;  %335 = vrot.lane.b32.xlu1 %v2092_v0, %s2219_s15 }
  0x35   :  { %337 = vrot.lane.b32.xlu0 %v2095_v2, %s2219_s15  ;;  %333 = vrot.lane.b32.xlu1 %v2094_v1, %s2219_s15 }
  0x39   :  { %471 = vrot.lane.b32.xlu0 %v2280_v3, %s2214_s11  ;;  %473 = vrot.lane.b32.xlu1 %v2299_v5, %s2214_s11 }
  0x3d   :  { %149 = vrot.lane.b32.xlu0 %v2100_v6, %s2214_s11  ;;  %373 = vrot.lane.b32.xlu1 %v2092_v0, %s2220_s16 }
  0x41   :  { %375 = vrot.lane.b32.xlu0 %v2095_v2, %s2220_s16  ;;  %371 = vrot.lane.b32.xlu1 %v2094_v1, %s2220_s16 }
  0x45   :  { %508 = vrot.lane.b32.xlu0 %v2280_v3, %s2215_s12  ;;  %510 = vrot.lane.b32.xlu1 %v2299_v5, %s2215_s12 }
  0x49   :  { %187 = vrot.lane.b32.xlu0 %v2100_v6, %s2215_s12  ;;  %411 = vrot.lane.b32.xlu1 %v2092_v0, %s2221_s17  ;;  %v2429_v0 = vld [vmem:[%s2967_s1] ss:$8 sps:$4 sm:$0xff]  }
  0x4d   :  { %413 = vrot.lane.b32.xlu0 %v2095_v2, %s2221_s17  ;;  %409 = vrot.lane.b32.xlu1 %v2094_v1, %s2221_s17  ;;  %v2434_v2 = vld [vmem:[%s2967_s1 + $0x14] ss:$8 sps:$4 sm:$0xff]  }
  0x51   :  { %545 = vrot.lane.b32.xlu0 %v2280_v3, %s2216_s0  ;;  %547 = vrot.lane.b32.xlu1 %v2299_v5, %s2216_s0 }
  0x55   :  { %225 = vrot.lane.b32.xlu0 %v2100_v6, %s2216_s0  ;;  %582 = vrot.lane.b32.xlu1 %v2280_v3, %s2217_s13 }
  0x59   :  { %584 = vrot.lane.b32.xlu0 %v2299_v5, %s2217_s13  ;;  %263 = vrot.lane.b32.xlu1 %v2100_v6, %s2217_s13 }
  0x5d   :  { %475 = vrot.lane.b32.xlu0 %v2101_v8, %s2214_s11  ;;  %477 = vrot.lane.b32.xlu1 %v2103_v9, %s2214_s11 }
  0x61   :  { %619 = vrot.lane.b32.xlu0 %v2280_v3, %s2218_s14  ;;  %621 = vrot.lane.b32.xlu1 %v2299_v5, %s2218_s14 }
  0x65   :  { %301 = vrot.lane.b32.xlu0 %v2100_v6, %s2218_s14  ;;  %512 = vrot.lane.b32.xlu1 %v2101_v8, %s2215_s12 }
  0x69   :  { %514 = vrot.lane.b32.xlu0 %v2103_v9, %s2215_s12  ;;  %656 = vrot.lane.b32.xlu1 %v2280_v3, %s2219_s15 }
  0x6d   :  { %658 = vrot.lane.b32.xlu0 %v2299_v5, %s2219_s15  ;;  %339 = vrot.lane.b32.xlu1 %v2100_v6, %s2219_s15 }
  0x71   :  { %549 = vrot.lane.b32.xlu0 %v2101_v8, %s2216_s0  ;;  %551 = vrot.lane.b32.xlu1 %v2103_v9, %s2216_s0 }
  0x75   :  { %693 = vrot.lane.b32.xlu0 %v2280_v3, %s2220_s16  ;;  %695 = vrot.lane.b32.xlu1 %v2299_v5, %s2220_s16 }
  0x79   :  { %377 = vrot.lane.b32.xlu0 %v2100_v6, %s2220_s16  ;;  %586 = vrot.lane.b32.xlu1 %v2101_v8, %s2217_s13 }
  0x7d   :  { %588 = vrot.lane.b32.xlu0 %v2103_v9, %s2217_s13  ;;  %730 = vrot.lane.b32.xlu1 %v2280_v3, %s2221_s17 }
  0x81   :  { %732 = vrot.lane.b32.xlu0 %v2299_v5, %s2221_s17  ;;  %415 = vrot.lane.b32.xlu1 %v2100_v6, %s2221_s17 }
  0x85   :  { %623 = vrot.lane.b32.xlu0 %v2101_v8, %s2218_s14  ;;  %625 = vrot.lane.b32.xlu1 %v2103_v9, %s2218_s14 }
  0x87   :  { %v146_v10 = vpop.permute.xlu0 %145  ;;  %v144_v11 = vpop.permute.xlu1 %143 }
  0x88   :  { %v152_v16 = vsel %vm151_vm1, %v144_v11, %v146_v10 }
  0x89   :  { %660 = vrot.lane.b32.xlu0 %v2101_v8, %s2219_s15  ;;  %662 = vrot.lane.b32.xlu1 %v2103_v9, %s2219_s15 }
  0x8b   :  { %v2368_v12 = vpop.permute.xlu0 %147  ;;  %v184_v14 = vpop.permute.xlu1 %183 }
  0x8c   :  { %v153_v15 = vsel %vm151_vm1, %v146_v10, %v2368_v12  ;;  %v2446_v10 = vld [vmem:[%s2967_s1 + $0x10] ss:$8 sps:$4 sm:$0xff]   ;;  %s2223_s1 = smov 19  }
  0x8d   :  { %697 = vrot.lane.b32.xlu0 %v2101_v8, %s2220_s16  ;;  %832 = vmatprep.subr.bf16.mxu0 %v153_v15 }
  0x8e   :  { %699 = vrot.lane.b32.xlu1 %v2103_v9, %s2220_s16  ;;  %833 = vmatpush1.bf16.msra.mxu0 %v152_v16 }
  0x8f   :  { %v2377_v17 = vpop.permute.xlu0 %185  ;;  %v182_v18 = vpop.permute.xlu1 %181 }
  0x90   :  { %v191_v19 = vsel %vm189_vm2, %v184_v14, %v2377_v17  ;;  %v190_v20 = vsel %vm189_vm2, %v182_v18, %v184_v14 }
  0x91   :  { %734 = vrot.lane.b32.xlu0 %v2101_v8, %s2221_s17  ;;  %834 = vmatprep.subr.bf16.mxu0 %v191_v19 }
  0x92   :  { %736 = vrot.lane.b32.xlu1 %v2103_v9, %s2221_s17  ;;  %835 = vmatpush1.bf16.msra.mxu0 %v190_v20 }
  0x93   :  { %v222_v22 = vpop.permute.xlu0 %221  ;;  %v2390_v24 = vpop.permute.xlu1 %223 }
  0x94   :  { %v229_v25 = vsel %vm227_vm3, %v222_v22, %v2390_v24 }
  0x95   :  { %993 = vperm.xlu0 %2060, %v989_v21   ;;  %836 = vmatprep.subr.bf16.mxu0 %v229_v25 }
  0x96   :  { %998 = vperm.xlu1 %2061, %v990_v23  }
  0x97   :  { %v220_v26 = vpop.permute.xlu0 %219  ;;  %v260_v27 = vpop.permute.xlu1 %259 }
  0x98   :  { %v228_v28 = vsel %vm227_vm3, %v220_v26, %v222_v22 }
  0x99   :  { %837 = vmatpush1.bf16.msra.mxu0 %v228_v28  ;;  %1090 = vperm.xlu0 %2060, %v990_v23  }
  0x9a   :  { %1085 = vperm.xlu1 %2061, %v989_v21  }
  0x9b   :  { %v2395_v29 = vpop.permute.xlu0 %261  ;;  %v258_v30 = vpop.permute.xlu1 %257 }
  0x9c   :  { %v267_v31 = vsel %vm265_vm4, %v260_v27, %v2395_v29  ;;  %v266_v32 = vsel %vm265_vm4, %v258_v30, %v260_v27 }
  0x9d   :  { %838 = vmatprep.subr.bf16.mxu0 %v267_v31  ;;  %2068 = vrot.lane.b32.xlu0 %v2222_v13, %s2224_s29 }
  0x9e   :  { %839 = vmatpush1.bf16.msra.mxu0 %v266_v32  ;;  %2063 = vrot.lane.b32.xlu1 %v2222_v13, %s2223_s1 }
  0x9f   :  { %v298_v33 = vpop.permute.xlu0 %297  ;;  %v2400_v34 = vpop.permute.xlu1 %299 }
  0xa0   :  { %v305_v35 = vsel %vm303_vm5, %v298_v33, %v2400_v34 }
  0xa1   :  { %840 = vmatprep.subr.bf16.mxu0 %v305_v35  ;;  %1254 = vrot.lane.b32.xlu0 %v2222_v13, %s2226_s7 }
  0xa2   :  { %1228 = vrot.lane.b32.xlu1 %v2222_v13, %s2225_s30 }
  0xa3   :  { %v296_v36 = vpop.permute.xlu0 %295  ;;  %v336_v37 = vpop.permute.xlu1 %335 }
  0xa4   :  { %v304_v38 = vsel %vm303_vm5, %v296_v36, %v298_v33 }
  0xa5   :  { %841 = vmatpush1.bf16.msra.mxu0 %v304_v38  ;;  %1462 = vrot.lane.b32.xlu0 %v2222_v13, %s2226_s7 }
  0xa6   :  { %1437 = vrot.lane.b32.xlu1 %v2222_v13, %s2225_s30 }
  0xa7   :  { %v2405_v39 = vpop.permute.xlu0 %337  ;;  %v334_v40 = vpop.permute.xlu1 %333 }
  0xa8   :  { %v343_v41 = vsel %vm341_vm6, %v336_v37, %v2405_v39  ;;  %v342_v42 = vsel %vm341_vm6, %v334_v40, %v336_v37 }
  0xa9   :  { %842 = vmatprep.subr.bf16.mxu0 %v343_v41 }
  0xaa   :  { %843 = vmatpush1.bf16.msra.mxu0 %v342_v42 }
  0xab   :  { %v472_v43 = vpop.permute.xlu0 %471  ;;  %v474_v44 = vpop.permute.xlu1 %473 }
  0xac   :  { %v479_v45 = vsel %vm151_vm1, %v472_v43, %v474_v44 }
  0xad   :  { %885 = vmatprep.subr.bf16.mxu1 %v479_v45 }
  0xaf   :  { %v150_v46 = vpop.permute.xlu0 %149  ;;  %v374_v47 = vpop.permute.xlu1 %373 }
  0xb0   :  { %v154_v48 = vsel %vm151_vm1, %v2368_v12, %v150_v46 }
  0xb1   :  { %886 = vmatpush1.bf16.msra.mxu1 %v154_v48 }
  0xb3   :  { %v2413_v49 = vpop.permute.xlu0 %375  ;;  %v372_v50 = vpop.permute.xlu1 %371 }
  0xb4   :  { %v381_v51 = vsel %vm379_vm7, %v374_v47, %v2413_v49  ;;  %v380_v52 = vsel %vm379_vm7, %v372_v50, %v374_v47 }
  0xb5   :  { %844 = vmatprep.subr.bf16.mxu0 %v381_v51 }
  0xb6   :  { %845 = vmatpush1.bf16.msra.mxu0 %v380_v52 }
  0xb7   :  { %v509_v53 = vpop.permute.xlu0 %508  ;;  %v511_v54 = vpop.permute.xlu1 %510 }
  0xb8   :  { %v516_v55 = vsel %vm189_vm2, %v509_v53, %v511_v54 }
  0xb9   :  { %887 = vmatprep.subr.bf16.mxu1 %v516_v55 }
  0xbb   :  { %v188_v56 = vpop.permute.xlu0 %187  ;;  %v412_v57 = vpop.permute.xlu1 %411 }
  0xbc   :  { %v192_v58 = vsel %vm189_vm2, %v2377_v17, %v188_v56 }
  0xbd   :  { %888 = vmatpush1.bf16.msra.mxu1 %v192_v58 }
  0xbf   :  { %v2421_v59 = vpop.permute.xlu0 %413  ;;  %v410_v61 = vpop.permute.xlu1 %409 }
  0xc0   :  { %v419_v62 = vsel %vm417_vm8, %v412_v57, %v2421_v59  ;;  %v418_v63 = vsel %vm417_vm8, %v410_v61, %v412_v57 }
  0xc1   :  { %846 = vmatprep.subr.bf16.mxu0 %v419_v62 }
  0xc2   :  { %847 = vmatpush1.bf16.msra.mxu0 %v418_v63 }
  0xc3   :  { %v546_v1 = vpop.permute.xlu0 %545  ;;  %936 = vmatprep.subr.bf16.mxu0 %v2107_v60  ;;  %v548_v3 = vpop.permute.xlu1 %547 }
  0xc4   :  { %v553_v4 = vsel %vm227_vm3, %v546_v1, %v548_v3 }
  0xc5   :  { %863 = vmatmul.mubr.bf16.vlgmr.msra.gmra.mrb[0].mxu0 %v2429_v0  ;;  %889 = vmatprep.subr.bf16.mxu1 %v553_v4 }
  0xc6   :  { %937 = vmatpush1.bf16.msra.mxu0 %v2299_v5  ;;  %2006 = vmatprep.mubr.msk.bf16.mxu0 %vm823_vm0, %v2434_v2 }
  0xc7   :  { %v226_v6 = vpop.permute.xlu0 %225  ;;  %v583_v8 = vpop.permute.xlu1 %582 }
  0xc8   :  { %v230_v9 = vsel %vm227_vm3, %v2390_v24, %v226_v6 }
  0xc9   :  { %890 = vmatpush1.bf16.msra.mxu1 %v230_v9 }
  0xcb   :  { %v585_v11 = vpop.permute.xlu0 %584  ;;  %v264_v12 = vpop.permute.xlu1 %263 }
  0xcc   :  { %v590_v14 = vsel %vm265_vm4, %v583_v8, %v585_v11  ;;  %v268_v5 = vsel %vm265_vm4, %v2395_v29, %v264_v12 }
  0xcd   :  { %891 = vmatprep.subr.bf16.mxu1 %v590_v14  ;;  %873 = vmatmul.mubr.bf16.gmra.mrb[4].mxu0 %v2446_v10 }
  0xce   :  { %892 = vmatpush1.bf16.msra.mxu1 %v268_v5  ;;  %2009 = vmatprep.mubr.msk.bf16.mxu0 %vm823_vm0, %v2318_v7 }
  0xcf   :  { %v476_v15 = vpop.permute.xlu0 %475  ;;  %v478_v17 = vpop.permute.xlu1 %477 }
  0xd0   :  { %v480_v16 = vsel %vm151_vm1, %v474_v44, %v476_v15  ;;  %v481_v18 = vsel %vm151_vm1, %v476_v15, %v478_v17 }
  0xd1   :  { %938 = vmatprep.subr.bf16.mxu0 %v481_v18 }
  0xd2   :  { %939 = vmatpush1.bf16.msra.mxu0 %v480_v16 }
  0xd3   :  { %v620_v19 = vpop.permute.xlu0 %619  ;;  %v622_v20 = vpop.permute.xlu1 %621 }
  0xd4   :  { %v627_v21 = vsel %vm303_vm5, %v620_v19, %v622_v20 }
  0xd5   :  { %893 = vmatprep.subr.bf16.mxu1 %v627_v21 }
  0xd7   :  { %v302_v22 = vpop.permute.xlu0 %301  ;;  %v513_v23 = vpop.permute.xlu1 %512 }
  0xd8   :  { %v306_v24 = vsel %vm303_vm5, %v2400_v34, %v302_v22  ;;  %v517_v27 = vsel %vm189_vm2, %v511_v54, %v513_v23 }
  0xd9   :  { %894 = vmatpush1.bf16.msra.mxu1 %v306_v24 }
  0xdb   :  { %v515_v7 = vpop.permute.xlu0 %514  ;;  %v657_v25 = vpop.permute.xlu1 %656 }
  0xdc   :  { %v518_v26 = vsel %vm189_vm2, %v513_v23, %v515_v7 }
  0xdd   :  { %940 = vmatprep.subr.bf16.mxu0 %v518_v26 }
  0xde   :  { %941 = vmatpush1.bf16.msra.mxu0 %v517_v27 }
  0xdf   :  { %v659_v28 = vpop.permute.xlu0 %658  ;;  %v340_v29 = vpop.permute.xlu1 %339 }
  0xe0   :  { %v664_v30 = vsel %vm341_vm6, %v657_v25, %v659_v28  ;;  %v344_v31 = vsel %vm341_vm6, %v2405_v39, %v340_v29 }
  0xe1   :  { %895 = vmatprep.subr.bf16.mxu1 %v664_v30 }
  0xe2   :  { %896 = vmatpush1.bf16.msra.mxu1 %v344_v31 }
  0xe3   :  { %v550_v32 = vpop.permute.xlu0 %549  ;;  %v552_v34 = vpop.permute.xlu1 %551 }
  0xe4   :  { %v554_v33 = vsel %vm227_vm3, %v548_v3, %v550_v32  ;;  %v555_v35 = vsel %vm227_vm3, %v550_v32, %v552_v34 }
  0xe5   :  { %942 = vmatprep.subr.bf16.mxu0 %v555_v35 }
  0xe6   :  { %943 = vmatpush1.bf16.msra.mxu0 %v554_v33 }
  0xe7   :  { %v694_v36 = vpop.permute.xlu0 %693  ;;  %v696_v37 = vpop.permute.xlu1 %695 }
  0xe8   :  { %v701_v38 = vsel %vm379_vm7, %v694_v36, %v696_v37 }
  0xe9   :  { %897 = vmatprep.subr.bf16.mxu1 %v701_v38 }
  0xeb   :  { %v378_v40 = vpop.permute.xlu0 %377  ;;  %v587_v41 = vpop.permute.xlu1 %586 }
  0xec   :  { %v382_v42 = vsel %vm379_vm7, %v2413_v49, %v378_v40  ;;  %v591_v45 = vsel %vm265_vm4, %v585_v11, %v587_v41 }
  0xed   :  { %898 = vmatpush1.bf16.msra.mxu1 %v382_v42 }
  0xef   :  { %v589_v39 = vpop.permute.xlu0 %588  ;;  %v731_v43 = vpop.permute.xlu1 %730 }
  0xf0   :  { %v592_v44 = vsel %vm265_vm4, %v587_v41, %v589_v39 }
  0xf1   :  { %944 = vmatprep.subr.bf16.mxu0 %v592_v44 }
  0xf2   :  { %945 = vmatpush1.bf16.msra.mxu0 %v591_v45 }
  0xf3   :  { %v733_v46 = vpop.permute.xlu0 %732  ;;  %v416_v47 = vpop.permute.xlu1 %415 }
  0xf4   :  { %v738_v48 = vsel %vm417_vm8, %v731_v43, %v733_v46  ;;  %v420_v50 = vsel %vm417_vm8, %v2421_v59, %v416_v47 }
  0xf5   :  { %899 = vmatprep.subr.bf16.mxu1 %v738_v48 }
  0xf6   :  { %900 = vmatpush1.bf16.msra.mxu1 %v420_v50 }
  0xf7   :  { %v624_v51 = vpop.permute.xlu0 %623  ;;  %v626_v52 = vpop.permute.xlu1 %625 }
  0xf8   :  { %v628_v49 = vsel %vm303_vm5, %v622_v20, %v624_v51  ;;  %v629_v53 = vsel %vm303_vm5, %v624_v51, %v626_v52 }
  0xf9   :  { %916 = vmatmul.mubr.bf16.vlgmr.msra.gmra.mrb[0].mxu1 %v2429_v0  ;;  %946 = vmatprep.subr.bf16.mxu0 %v629_v53 }
  0xfa   :  { %2008 = vmatprep.mubr.msk.bf16.mxu1 %vm823_vm0, %v2434_v2  ;;  %947 = vmatpush1.bf16.msra.mxu0 %v628_v49 }
  0xfb   :  { %v661_v54 = vpop.permute.xlu0 %660  ;;  %v663_v56 = vpop.permute.xlu1 %662 }
  0xfc   :  { %v665_v55 = vsel %vm341_vm6, %v659_v28, %v661_v54  ;;  %v666_v57 = vsel %vm341_vm6, %v661_v54, %v663_v56 }
  0xfd   :  { %948 = vmatprep.subr.bf16.mxu0 %v666_v57 }
  0xfe   :  { %949 = vmatpush1.bf16.msra.mxu0 %v665_v55 }
  0xff   :  { %v698_v58 = vpop.permute.xlu0 %697 }
 0x100   :  { %v702_v59 = vsel %vm379_vm7, %v696_v37, %v698_v58  ;;  %v700_v60 = vpop.permute.xlu1 %699 }
 0x101   :  { %v703_v61 = vsel %vm379_vm7, %v698_v58, %v700_v60  ;;  %926 = vmatmul.mubr.bf16.gmra.mrb[4].mxu1 %v2446_v10 }
 0x102   :  { %950 = vmatprep.subr.bf16.mxu0 %v703_v61 }
 0x103   :  { %951 = vmatpush1.bf16.msra.mxu0 %v702_v59  ;;  %v735_v62 = vpop.permute.xlu0 %734 }
 0x104   :  { %v739_v63 = vsel %vm417_vm8, %v733_v46, %v735_v62  ;;  %v737_v1 = vpop.permute.xlu1 %736 }
 0x105   :  { %v740_v3 = vsel %vm417_vm8, %v735_v62, %v737_v1 }
 0x106   :  { %952 = vmatprep.subr.bf16.mxu0 %v740_v3 }
 0x107   :  { %953 = vmatpush1.bf16.msra.mxu0 %v739_v63 }
 0x10a   :  { %969 = vmatmul.mubr.bf16.vlgmr.msra.gmra.mrb[8].mxu0 %v2429_v0  ;;  %v39_v0 = vlaneseq }
 0x10b   :  { %2010 = vmatprep.mubr.msk.bf16.mxu0 %vm823_vm0, %v2434_v2 }
 0x10c   :  { %v2502_v2 = vand.u32 127, %v39_v0 }
 0x10e   :  { %v41_v4 = vadd.s32 128, %v2502_v2  ;;  %v2506_v6 = vmul.u32.u64.low 3817748708, %v2502_v2  ;;  %v2507_v8 = vmul.u32.u64.high 3817748708, %v2502_v2, %v2506_v6  ;;  %v42_v3 = vadd.s32 256, %v2502_v2 }
 0x110   :  { %v49_v11 = vshrl.u32 %v2507_v8, 4 }
 0x112   :  { %979 = vmatmul.mubr.bf16.gmra.mrb[12].mxu0 %v2446_v10  ;;  %v2509_v9 = vmul.u32.u64.low 3817748708, %v41_v4  ;;  %v2510_v10 = vmul.u32.u64.high 3817748708, %v41_v4, %v2509_v9  ;;  %v50_v16 = vmul.u32 18, %v49_v11 }
 0x114   :  { %v60_v12 = vshrl.u32 %v2510_v10, 4  ;;  %v2514_v14 = vpop.permute.xlu0 %993  ;;  %v51_v25 = vsub.s32 %v2502_v2, %v50_v16 }
 0x115   :  { %v2516_v15 = vpop.permute.xlu1 %998 }
 0x116   :  { %v61_v19 = vmul.u32 18, %v60_v12  ;;  %vm76_vm9 = vcmp.ne.s32.totalorder %v51_v25, 0  ;;  %vm79_vm10 = vcmp.lt.s32.totalorder %v51_v25, 0  ;;  %v85_v32 = vadd.s32 18, %v51_v25 }
 0x117   :  { %vm82_vm13 = vmand %vm79_vm10, %vm76_vm9  ;;  %vm96_vm9 = vcmp.lt.s32.totalorder %v42_v3, 288 }
 0x118   :  { %v62_v28 = vsub.s32 %v41_v4, %v61_v19  ;;  %v88_v38 = vsel %vm82_vm13, %v85_v32, %v51_v25  ;;  %v2584_v0 = vmul.u32.u64.low 3817748708, %v42_v3  ;;  %v2585_v4 = vmul.u32.u64.high 3817748708, %v42_v3, %v2584_v0 }
 0x119   :  { %vm2537_vm15 = vcmp.lt.s32.totalorder %v88_v38, 16  ;;  %v1086_v10 = vpop.permute.xlu1 %1085  ;;  %vm1236_vm13 = vcmask 138240  }
 0x11a   :  { %vm77_vm11 = vcmp.ne.s32.totalorder %v62_v28, 0  ;;  %vm80_vm12 = vcmp.lt.s32.totalorder %v62_v28, 0  ;;  %v86_v34 = vadd.s32 18, %v62_v28  ;;  %v71_v6 = vshrl.u32 %v2585_v4, 4 }
 0x11b   :  { %vm2531_vm14 = vmand %vm80_vm12, %vm77_vm11  ;;  %vm1184_vm11 = vcmask 154624   ;;  %vm1210_vm12 = vcmask 146432  }
 0x11c   :  { %v89_v42 = vsel %vm2531_vm14, %v86_v34, %v62_v28  ;;  %v72_v8 = vmul.u32 18, %v71_v6  ;;  %vm1262_vm14 = vcmask 7168  }
 0x11d   :  { %vm2543_vm2 = vcmp.lt.s32.totalorder %v89_v42, 16 }
 0x198   :  { %v864_v5 = vpop.f32.mrb[0].mxu0 }
 0x199   :  { %v866_v17 = vpop.f32.mrb[1].mxu0  ;;  %v1001_v18 = vadd.f32 %v2514_v14, %v864_v5  ;;  %v73_v5 = vsub.s32 %v42_v3, %v72_v8 }
 0x19a   :  { %v1002_v20 = vadd.f32 %v2514_v14, %v866_v17  ;;  %v868_v21 = vpop.f32.mrb[2].mxu0 }
 0x19b   :  { %v1013_v22 = vmul.f32 0.70710677, %v1001_v18  ;;  %v1004_v23 = vadd.f32 %v2516_v15, %v868_v21  ;;  %v870_v24 = vpop.f32.mrb[3].mxu0  ;;  %v1007_v37 = vmul.f32 0.5, %v1001_v18  ;;  %v1091_v18 = vpop.permute.xlu0 %1090  ;;  %vm78_vm5 = vcmp.ne.s32.totalorder %v73_v5, 0 }
 0x19c   :  { %v1014_v7 = vmul.f32 0.70710677, %v1002_v20  ;;  %v1005_v26 = vadd.f32 %v2516_v15, %v870_v24  ;;  %v1008_v41 = vmul.f32 0.5, %v1002_v20  ;;  %vm81_vm6 = vcmp.lt.s32.totalorder %v73_v5, 0 }
 0x19d   :  { %2115 = verf.f32 %v1013_v22  ;;  %v1016_v27 = vmul.f32 0.70710677, %v1004_v23  ;;  %v1010_v44 = vmul.f32 0.5, %v1004_v23  ;;  %vm84_vm7 = vmand %vm81_vm6, %vm78_vm5 }
 0x19e   :  { %2117 = verf.f32 %v1014_v7  ;;  %v1017_v29 = vmul.f32 0.70710677, %v1005_v26  ;;  %v1011_v48 = vmul.f32 0.5, %v1005_v26  ;;  %v87_v7 = vadd.s32 18, %v73_v5  ;;  %vm2016_vm5 = vmpackc.low %vm2543_vm2, %vm2543_vm2 }
 0x19f   :  { %2119 = verf.f32 %v1016_v27  ;;  %vm2019_vm6 = vmpackc.low %vm2537_vm15, %vm2537_vm15 }
 0x1a0   :  { %2121 = verf.f32 %v1017_v29  ;;  %v2523_v30 = vpop.f32.mrb[4].mxu0 }
 0x1a1   :  { %v2525_v31 = vpop.f32.mrb[5].mxu0 }
 0x1a2   :  { %v2527_v33 = vpop.f32.mrb[6].mxu0 }
 0x1a3   :  { %v2529_v35 = vpop.f32.mrb[7].mxu0 }
 0x1a7   :  { %v2116_v40 = vpop.eup %2115 }
 0x1a8   :  { %v2118_v39 = vpop.eup %2117  ;;  %v1025_v43 = vadd.f32 1.0, %v2116_v40 }
 0x1a9   :  { %v2120_v45 = vpop.eup %2119  ;;  %v1026_v46 = vadd.f32 1.0, %v2118_v39 }
 0x1aa   :  { %v2122_v50 = vpop.eup %2121  ;;  %v2541_v51 = vmul.f32 %v1025_v43, %v1007_v37  ;;  %v1028_v49 = vadd.f32 1.0, %v2120_v45 }
 0x1ab   :  { %v2547_v53 = vmul.f32 %v1026_v46, %v1008_v41  ;;  %v1029_v54 = vadd.f32 1.0, %v2122_v50 }
 0x1ac   :  { %v2549_v55 = vmul.f32 %v1028_v49, %v1010_v44  ;;  %v1043_v56 = vsel %vm2537_vm15, %v2541_v51, 0.0 }
 0x1ad   :  { %v2554_v57 = vmul.f32 %v1029_v54, %v1011_v48  ;;  %v1044_v58 = vsel %vm2543_vm2, %v2547_v53, 0.0 }
 0x1ae   :  { %v1046_v59 = vsel %vm2537_vm15, %v2549_v55, 0.0 }
 0x1af   :  { %v2564_v61 = vpack.c.bf16 %v1046_v59, %v1043_v56  ;;  %v1047_v62 = vsel %vm2543_vm2, %v2554_v57, 0.0 }
 0x1b0   :  { %v2571_v1 = vpack.c.bf16 %v1047_v62, %v1044_v58 }
 0x1b1   :  { %1178 = vrot.lane.b32.xlu1 %v2564_v61, %s2223_s1  ;;  %1204 = vrot.lane.b32.xlu0 %v2564_v61, %s2224_s29 }
 0x1b5   :  { %1230 = vrot.lane.b32.xlu1 %v2564_v61, %s2225_s30  ;;  %1256 = vrot.lane.b32.xlu0 %v2564_v61, %s2226_s7 }
 0x1b9   :  { %1286 = vrot.lane.b32.xlu1 %v2564_v61, %s2214_s11 }
 0x1cc   :  { %v917_v9 = vpop.f32.mrb[0].mxu1 }
 0x1cd   :  { %v1003_v11 = vadd.f32 %v2514_v14, %v917_v9  ;;  %v919_v12 = vpop.f32.mrb[1].mxu1  ;;  %v90_v14 = vsel %vm84_vm7, %v87_v7, %v73_v5  ;;  %vm1319_vm7 = vcmask 908288  }
 0x1ce   :  { %v1093_v16 = vadd.f32 %v1086_v10, %v919_v12  ;;  %v921_v17 = vpop.f32.mrb[2].mxu1  ;;  %vm93_vm8 = vcmp.lt.s32.totalorder %v90_v14, 16 }
 0x1cf   :  { %v1015_v19 = vmul.f32 0.70710677, %v1003_v11  ;;  %v1006_v20 = vadd.f32 %v2516_v15, %v921_v17  ;;  %v923_v21 = vpop.f32.mrb[3].mxu1  ;;  %v1009_v27 = vmul.f32 0.5, %v1003_v11  ;;  %vm2590_vm10 = vmand %vm93_vm8, %vm96_vm9 }
 0x1d0   :  { %v1105_v2 = vmul.f32 0.70710677, %v1093_v16  ;;  %v1096_v22 = vadd.f32 %v1091_v18, %v923_v21  ;;  %v1099_v29 = vmul.f32 0.5, %v1093_v16  ;;  %vm2025_vm8 = vmpackc.low %vm2590_vm10, %vm2590_vm10 }
 0x1d1   :  { %2123 = verf.f32 %v1015_v19  ;;  %v1018_v23 = vmul.f32 0.70710677, %v1006_v20  ;;  %v1012_v40 = vmul.f32 0.5, %v1006_v20 }
 0x1d2   :  { %2125 = verf.f32 %v1105_v2  ;;  %v1108_v24 = vmul.f32 0.70710677, %v1096_v22  ;;  %v1102_v44 = vmul.f32 0.5, %v1096_v22 }
 0x1d3   :  { %2127 = verf.f32 %v1018_v23 }
 0x1d4   :  { %2129 = verf.f32 %v1108_v24 }
 0x1db   :  { %v2124_v25 = vpop.eup %2123 }
 0x1dc   :  { %v2126_v26 = vpop.eup %2125  ;;  %v1027_v15 = vadd.f32 1.0, %v2124_v25 }
 0x1dd   :  { %v2128_v28 = vpop.eup %2127  ;;  %v1117_v32 = vadd.f32 1.0, %v2126_v26  ;;  %v970_v34 = vpop.f32.mrb[8].mxu0 }
 0x1de   :  { %v2130_v36 = vpop.eup %2129  ;;  %v2594_v38 = vmul.f32 %v1027_v15, %v1009_v27  ;;  %v1030_v41 = vadd.f32 1.0, %v2128_v28  ;;  %v1094_v42 = vadd.f32 %v1086_v10, %v970_v34  ;;  %v972_v39 = vpop.f32.mrb[9].mxu0 }
 0x1df   :  { %v2596_v43 = vmul.f32 %v1117_v32, %v1099_v29  ;;  %v1120_v45 = vadd.f32 1.0, %v2130_v36  ;;  %v1095_v46 = vadd.f32 %v1086_v10, %v972_v39  ;;  %v974_v48 = vpop.f32.mrb[10].mxu0  ;;  %v2721_v39 = vpop.permute.xlu0 %2068 }
 0x1e0   :  { %v2598_v50 = vmul.f32 %v1030_v41, %v1012_v40  ;;  %v1106_v49 = vmul.f32 0.70710677, %v1094_v42  ;;  %v976_v54 = vpop.f32.mrb[11].mxu0  ;;  %v1045_v56 = vsel %vm2590_vm10, %v2594_v38, 0.0  ;;  %v1097_v4 = vadd.f32 %v1091_v18, %v974_v48 }
 0x1e1   :  { %v1129_v58 = vsel %vm2537_vm15, %v2596_v43, 0.0  ;;  %v2606_v59 = vmul.f32 %v1120_v45, %v1102_v44  ;;  %v1107_v62 = vmul.f32 0.70710677, %v1095_v46  ;;  %v1098_v12 = vadd.f32 %v1091_v18, %v976_v54  ;;  %v1782_v45 = vld [vmem:[%s2970_s4] sm:$0xff]  ;;  %v2739_v54 = vpop.f32.mrb[4].mxu1 }
 0x1e2   :  { %v1048_v3 = vsel %vm2590_vm10, %v2598_v50, 0.0  ;;  %2131 = verf.f32 %v1106_v49  ;;  %v1109_v11 = vmul.f32 0.70710677, %v1097_v4  ;;  %v1100_v18 = vmul.f32 0.5, %v1094_v42  ;;  %v2687_v42 = vld [vmem:[%s2969_s3 + $0x4] ss:$8 sps:$4 sm:$0xff]  }
 0x1e3   :  { %v1053_v6 = vpack.c.bf16 %v1048_v3, %v1045_v56  ;;  %v1132_v8 = vsel %vm2537_vm15, %v2606_v59, 0.0  ;;  %2133 = verf.f32 %v1107_v62  ;;  %v1110_v5 = vmul.f32 0.70710677, %v1098_v12  ;;  %2013 = vmatprep.mubr.msk.bf16.mxu1 %vm823_vm0, %v2687_v42  ;;  %2014 = vmatprep.mubr.msk.bf16.mxu0 %vm823_vm0, %v2687_v42  ;;  %v1783_v49 = vld [vmem:[%s2970_s4 + $0x8] sm:$0xff]  ;;  %v1057_v56 = vld [vmem:[%s2971_s5] sm:$0xff]  ;;  %v2746_v3 = vpop.f32.mrb[5].mxu1 }
 0x1e4   :  { %v2618_v10 = vpack.c.bf16 %v1132_v8, %v1129_v58  ;;  %2135 = verf.f32 %v1109_v11  ;;  %v1101_v22 = vmul.f32 0.5, %v1095_v46  ;;  %v1103_v23 = vmul.f32 0.5, %v1097_v4  ;;  %v2730_v46 = vpop.permute.xlu0 %1254  ;;  %v1058_v4 = vld [vmem:[%s2971_s5 + $0x8] sm:$0xff] }
 0x1e5   :  { %1290 = vrot.lane.b32.xlu0 %v1053_v6, %s2214_s11  ;;  %1315 = vrot.lane.b32.xlu1 %v1053_v6, %s2227_s8  ;;  %2137 = verf.f32 %v1110_v5  ;;  %v1104_v26 = vmul.f32 0.5, %v1098_v12  ;;  %v2985_v47 = vpack.c.bf16 %v2598_v50, %v2594_v38 }
 0x1e8   :  { %v2744_v58 = vpop.permute.xlu0 %1462 }
 0x1e9   :  { %1311 = vrot.lane.b32.xlu0 %v2564_v61, %s2227_s8  ;;  %1337 = vrot.lane.b32.xlu1 %v2564_v61, %s2216_s0 }
 0x1ec   :  { %v2132_v16 = vpop.eup %2131 }
 0x1ed   :  { %v2134_v17 = vpop.eup %2133  ;;  %v1118_v19 = vadd.f32 1.0, %v2132_v16  ;;  %1341 = vrot.lane.b32.xlu0 %v1053_v6, %s2216_s0  ;;  %1366 = vrot.lane.b32.xlu1 %v1053_v6, %s2217_s13 }
 0x1ee   :  { %v1119_v20 = vadd.f32 1.0, %v2134_v17  ;;  %v2136_v21 = vpop.eup %2135 }
 0x1ef   :  { %v2628_v2 = vmul.f32 %v1118_v19, %v1100_v18  ;;  %v1121_v24 = vadd.f32 1.0, %v2136_v21  ;;  %v2138_v7 = vpop.eup %2137 }
 0x1f0   :  { %v2633_v14 = vmul.f32 %v1119_v20, %v1101_v22  ;;  %v1122_v27 = vadd.f32 1.0, %v2138_v7 }
 0x1f1   :  { %1362 = vrot.lane.b32.xlu0 %v2564_v61, %s2217_s13  ;;  %1234 = vrot.lane.b32.xlu1 %v1053_v6, %s2225_s30  ;;  %v2635_v25 = vmul.f32 %v1121_v24, %v1103_v23  ;;  %v1130_v15 = vsel %vm2543_vm2, %v2628_v2, 0.0 }
 0x1f2   :  { %v2645_v29 = vmul.f32 %v1122_v27, %v1104_v26  ;;  %v1131_v34 = vsel %vm2590_vm10, %v2633_v14, 0.0 }
 0x1f3   :  { %v1133_v28 = vsel %vm2543_vm2, %v2635_v25, 0.0 }
 0x1f4   :  { %v1138_v32 = vpack.c.bf16 %v1133_v28, %v1130_v15  ;;  %v1134_v36 = vsel %vm2590_vm10, %v2645_v29, 0.0 }
 0x1f5   :  { %1182 = vrot.lane.b32.xlu0 %v1053_v6, %s2223_s1  ;;  %1206 = vrot.lane.b32.xlu1 %v2571_v1, %s2224_s29  ;;  %v1139_v41 = vpack.c.bf16 %v1134_v36, %v1131_v34 }
 0x1f9   :  { %1208 = vrot.lane.b32.xlu0 %v1053_v6, %s2224_s29  ;;  %1258 = vrot.lane.b32.xlu1 %v2571_v1, %s2226_s7 }
 0x1fd   :  { %1288 = vrot.lane.b32.xlu1 %v2571_v1, %s2214_s11  ;;  %1180 = vrot.lane.b32.xlu0 %v2571_v1, %s2223_s1 }
 0x201   :  { %1339 = vrot.lane.b32.xlu1 %v2571_v1, %s2216_s0  ;;  %1260 = vrot.lane.b32.xlu0 %v1053_v6, %s2226_s7  ;;  %v2753_v6 = vpop.f32.mrb[6].mxu1 }
 0x202   :  { %v2757_v12 = vpop.f32.mrb[7].mxu1 }
 0x205   :  { %1389 = vrot.lane.b32.xlu1 %v2618_v10, %s2223_s1  ;;  %1232 = vrot.lane.b32.xlu0 %v2571_v1, %s2225_s30 }
 0x209   :  { %1414 = vrot.lane.b32.xlu1 %v2618_v10, %s2224_s29  ;;  %2073 = vrot.lane.b32.xlu0 %v2222_v13, %s2214_s11 }
 0x20d   :  { %1464 = vrot.lane.b32.xlu1 %v2618_v10, %s2226_s7  ;;  %1313 = vrot.lane.b32.xlu0 %v2571_v1, %s2227_s8 }
 0x211   :  { %1493 = vrot.lane.b32.xlu1 %v2618_v10, %s2214_s11  ;;  %1364 = vrot.lane.b32.xlu0 %v2571_v1, %s2217_s13  ;;  %v2714_v1 = vpop.permute.xlu1 %2063 }
 0x212   :  { %v2065_v34 = vunpack.i.l.bf16 %v2714_v1  ;;  %v2066_v9 = vunpack.i.h.bf16 %v2714_v1  ;;  %v2071_v1 = vunpack.i.h.bf16 %v2721_v39 }
 0x215   :  { %1518 = vrot.lane.b32.xlu1 %v2618_v10, %s2227_s8  ;;  %1439 = vrot.lane.b32.xlu0 %v2618_v10, %s2225_s30  ;;  %v2723_v44 = vpop.permute.xlu1 %1228 }
 0x219   :  { %1441 = vrot.lane.b32.xlu1 %v1138_v32, %s2225_s30  ;;  %1391 = vrot.lane.b32.xlu0 %v1138_v32, %s2223_s1  ;;  %v2732_v48 = vpop.permute.xlu1 %1437 }
 0x21d   :  { %1416 = vrot.lane.b32.xlu0 %v1138_v32, %s2224_s29  ;;  %1393 = vrot.lane.b32.xlu1 %v1139_v41, %s2223_s1 }
 0x221   :  { %1466 = vrot.lane.b32.xlu0 %v1138_v32, %s2226_s7  ;;  %1418 = vrot.lane.b32.xlu1 %v1139_v41, %s2224_s29 }
 0x223   :  { %v1179_v62 = vpop.permute.xlu1 %1178  ;;  %v1205_v8 = vpop.permute.xlu0 %1204 }
 0x225   :  { %1495 = vrot.lane.b32.xlu0 %v1138_v32, %s2214_s11  ;;  %1543 = vrot.lane.b32.xlu1 %v2618_v10, %s2216_s0 }
 0x227   :  { %v1257_v17 = vpop.permute.xlu0 %1256 }
 0x229   :  { %1443 = vrot.lane.b32.xlu0 %v1139_v41, %s2225_s30  ;;  %1468 = vrot.lane.b32.xlu1 %v1139_v41, %s2226_s7 }
 0x22d   :  { %1520 = vrot.lane.b32.xlu0 %v1138_v32, %s2227_s8  ;;  %1568 = vrot.lane.b32.xlu1 %v2618_v10, %s2217_s13  ;;  %v1231_v10 = vpop.permute.xlu1 %1230 }
 0x231   :  { %2078 = vrot.lane.b32.xlu0 %v2222_v13, %s2227_s8  ;;  %1497 = vrot.lane.b32.xlu1 %v1139_v41, %s2214_s11  ;;  %v2763_v19 = vpop.permute.xlu1 %1286 }
 0x235   :  { %1545 = vrot.lane.b32.xlu0 %v1138_v32, %s2216_s0  ;;  %1522 = vrot.lane.b32.xlu1 %v1139_v41, %s2227_s8 }
 0x239   :  { %2083 = vrot.lane.b32.xlu0 %v2222_v13, %s2216_s0  ;;  %1547 = vrot.lane.b32.xlu1 %v1139_v41, %s2216_s0 }
 0x23d   :  { %1570 = vrot.lane.b32.xlu0 %v1138_v32, %s2217_s13  ;;  %1572 = vrot.lane.b32.xlu1 %v1139_v41, %s2217_s13 }
 0x241   :  { %2088 = vrot.lane.b32.xlu0 %v2222_v13, %s2217_s13  ;;  %1786 = vperm.xlu1 %2061, %v1782_v45   ;;  %v2748_v13 = vpop.f32.mrb[12].mxu0 }
 0x242   :  { %v2755_v11 = vpop.f32.mrb[13].mxu0 }
 0x243   :  { %v2759_v5 = vpop.f32.mrb[14].mxu0 }
 0x244   :  { %v2761_v16 = vpop.f32.mrb[15].mxu0 }
 0x245   :  { %1791 = vperm.xlu0 %2060, %v1783_v49   ;;  %1852 = vperm.xlu1 %2061, %v1782_v45   ;;  %2981 = vst [vmem:[#allocation10_spill] sm:$0xff] %v2761_v16 }
 0x249   :  { %1857 = vperm.xlu0 %2060, %v1783_v49   ;;  %1061 = vperm.xlu1 %2061, %v1057_v56   ;;  %v2070_v49 = vunpack.i.l.bf16 %v2721_v39  ;;  %v1263_v39 = vsel %vm1262_vm14, %v2730_v46, %v1257_v17  ;;  %v2983_v46 = vpack.c.bf16 %v2549_v55, %v2541_v51 }
 0x24b   :  { %v1211_v0 = vsel %vm1210_vm12, %v2070_v49, %v1205_v8 }
 0x24d   :  { %1066 = vperm.xlu0 %2060, %v1058_v4   ;;  %1147 = vperm.xlu1 %2061, %v1057_v56   ;;  %v1185_v56 = vsel %vm1184_vm11, %v2065_v34, %v1179_v62  ;;  %v1237_v34 = vsel %vm1236_vm13, %v2723_v44, %v1231_v10 }
 0x251   :  { %1152 = vperm.xlu0 %2060, %v1058_v4  }
 0x257   :  { %v2765_v18 = vpop.permute.xlu0 %1290  ;;  %v2767_v20 = vpop.permute.xlu1 %1315 }
 0x25b   :  { %v2769_v21 = vpop.permute.xlu0 %1311  ;;  %v2771_v22 = vpop.permute.xlu1 %1337 }
 0x25f   :  { %v2773_v23 = vpop.permute.xlu0 %1341  ;;  %v2775_v24 = vpop.permute.xlu1 %1366 }
 0x263   :  { %v2777_v7 = vpop.permute.xlu0 %1362  ;;  %v2779_v26 = vpop.permute.xlu1 %1234 }
 0x267   :  { %v1183_v27 = vpop.permute.xlu0 %1182  ;;  %v1207_v15 = vpop.permute.xlu1 %1206 }
 0x268   :  { %v1212_v4 = vsel %vm1210_vm12, %v1205_v8, %v1207_v15 }
 0x26b   :  { %v1209_v28 = vpop.permute.xlu0 %1208  ;;  %v2781_v32 = vpop.permute.xlu1 %1258 }
 0x26c   :  { %v1213_v44 = vsel %vm1210_vm12, %v1207_v15, %v1209_v28 }
 0x26f   :  { %v1289_v36 = vpop.permute.xlu1 %1288  ;;  %v1181_v41 = vpop.permute.xlu0 %1180 }
 0x270   :  { %v1186_v45 = vsel %vm1184_vm11, %v1179_v62, %v1181_v41  ;;  %v1294_v15 = vsel %vm151_vm1, %v2763_v19, %v1289_v36 }
 0x271   :  { %1653 = vmatprep.subr.bf16.mxu1 %v1186_v45  ;;  %v1187_v45 = vsel %vm1184_vm11, %v1181_v41, %v1183_v27 }
 0x272   :  { %1654 = vmatpush1.bf16.msra.mxu1 %v1185_v56 }
 0x273   :  { %v1340_v61 = vpop.permute.xlu1 %1339  ;;  %1655 = vmatprep.subr.bf16.mxu1 %v1212_v4  ;;  %v1261_v40 = vpop.permute.xlu0 %1260 }
 0x274   :  { %v1346_v19 = vsel %vm227_vm3, %v1340_v61, %v2773_v23 }
 0x276   :  { %1656 = vmatpush1.bf16.msra.mxu1 %v1211_v0  ;;  %v1264_v0 = vsel %vm1262_vm14, %v1257_v17, %v2781_v32 }
 0x277   :  { %v2790_v60 = vpop.permute.xlu1 %1389  ;;  %v1233_v63 = vpop.permute.xlu0 %1232 }
 0x278   :  { %v1238_v16 = vsel %vm1236_vm13, %v1231_v10, %v1233_v63  ;;  %v1395_v62 = vsel %vm1184_vm11, %v2066_v9, %v2790_v60  ;;  %v1239_v56 = vsel %vm1236_vm13, %v1233_v63, %v2779_v26  ;;  %v1345_v63 = vsel %vm227_vm3, %v2771_v22, %v1340_v61  ;;  %v2873_v22 = vld [vmem:[%s2969_s3] ss:$8 sps:$4 sm:$0xff]   ;;  %s2228_s3 = smov [#allocation7]  }
 0x279   :  { %1657 = vmatprep.subr.bf16.mxu1 %v1238_v16  ;;  %1696 = vmatprep.subr.bf16.mxu0 %v1395_v62  ;;  %v2982_v16 = vpack.c.bf16 %v2554_v57, %v2547_v53  ;;  %v1295_v53 = vsel %vm151_vm1, %v1289_v36, %v2765_v18  ;;  %s1919_s18 = sshll.u32 %s2228_s3, 4  ;;  %s1920_s18 = int_to_ptr.vmem [resolvable:$true] %s1919_s18 }
 0x27a   :  { %1658 = vmatpush1.bf16.msra.mxu1 %v1237_v34  ;;  %1697 = vmatpush1.bf16.msra.mxu0 %v1187_v45  ;;  %v2984_v34 = vpack.c.bf16 %v2606_v59, %v2596_v43  ;;  %s2185_s19 = scalar_lea.vmem %s1920_s18, 1536  ;;  %p2190_p9 = scmp.lt.s32.totalorder %s1920_s18, %s1920_s18 }
 0x27b   :  { %v2801_v8 = vpop.permute.xlu1 %1414  ;;  %1659 = vmatprep.subr.bf16.mxu1 %v1264_v0  ;;  %v2803_v49 = vpop.permute.xlu0 %2073  ;;  %p2186_p8 = scmp.ne.s32.totalorder %s1920_s18, %s2185_s19  ;;  %p2191_p10 = scmp.lt.s32.totalorder %s2185_s19, %s2185_s19 }
 0x27c   :  { %v1420_v9 = vsel %vm1210_vm12, %v2071_v1, %v2801_v8 }
 0x27d   :  { %1698 = vmatprep.subr.bf16.mxu0 %v1420_v9  ;;  %p2192_p11 = por %p2191_p10, %p2190_p9 }
 0x27e   :  { %1660 = vmatpush1.bf16.msra.mxu1 %v1263_v39  ;;  %1699 = vmatpush1.bf16.msra.mxu0 %v1213_v44 }
 0x27f   :  { %v2813_v10 = vpop.permute.xlu1 %1464  ;;  %2018 = vmatprep.subr.msk.bf16.mxu1 %vm2016_vm5, %v2982_v16  ;;  %v1314_v27 = vpop.permute.xlu0 %1313  ;;  %p2193_p12 = pnand %p2192_p11, %p2186_p8 }
 0x280   :  { %v1321_v51 = vsel %vm1319_vm7, %v1314_v27, %v2767_v20  ;;  %v1320_v4 = vsel %vm1319_vm7, %v2769_v21, %v1314_v27  ;;  %v1470_v36 = vsel %vm1262_vm14, %v2744_v58, %v2813_v10  ;;  %v1265_v21 = vsel %vm1262_vm14, %v2781_v32, %v1261_v40 }
 0x281   :  { %v2076_v32 = vunpack.i.h.bf16 %v2803_v49 }
 0x282   :  { %2021 = vmatpush1.bf16.msk.msra.mxu1 %vm2019_vm6, %v2983_v46 }
 0x283   :  { %v1494_v57 = vpop.permute.xlu1 %1493  ;;  %1663 = vmatprep.subr.bf16.mxu1 %v1295_v53  ;;  %v1365_v17 = vpop.permute.xlu0 %1364 }
 0x284   :  { %v1371_v26 = vsel %vm265_vm4, %v1365_v17, %v2775_v24  ;;  %v1370_v40 = vsel %vm265_vm4, %v2777_v7, %v1365_v17  ;;  %v2986_v17 = vpack.c.bf16 %v2645_v29, %v2633_v14 }
 0x286   :  { %1664 = vmatpush1.bf16.msra.mxu1 %v1294_v15 }
 0x287   :  { %v1519_v55 = vpop.permute.xlu1 %1518  ;;  %1665 = vmatprep.subr.bf16.mxu1 %v1321_v51  ;;  %v1440_v28 = vpop.permute.xlu0 %1439  ;;  %v2075_v51 = vunpack.i.l.bf16 %v2803_v49 }
 0x288   :  { %v1445_v41 = vsel %vm1236_vm13, %v2732_v48, %v1440_v28 }
 0x289   :  { %1700 = vmatprep.subr.bf16.mxu0 %v1445_v41 }
 0x28a   :  { %1666 = vmatpush1.bf16.msra.mxu1 %v1320_v4  ;;  %1701 = vmatpush1.bf16.msra.mxu0 %v1239_v56 }
 0x28b   :  { %1667 = vmatprep.subr.bf16.mxu1 %v1346_v19  ;;  %1702 = vmatprep.subr.bf16.mxu0 %v1470_v36  ;;  %v1442_v62 = vpop.permute.xlu1 %1441  ;;  %v1392_v48 = vpop.permute.xlu0 %1391 }
 0x28c   :  { %v1396_v45 = vsel %vm1184_vm11, %v2790_v60, %v1392_v48  ;;  %v1296_v60 = vsel %vm151_vm1, %v2765_v18, %v2076_v32 }
 0x28e   :  { %1668 = vmatpush1.bf16.msra.mxu1 %v1345_v63  ;;  %1703 = vmatpush1.bf16.msra.mxu0 %v1265_v21 }
 0x28f   :  { %1669 = vmatprep.subr.bf16.mxu1 %v1371_v26  ;;  %2024 = vmatprep.subr.msk.bf16.mxu0 %vm2019_vm6, %v2984_v34  ;;  %v1417_v58 = vpop.permute.xlu0 %1416  ;;  %v1394_v61 = vpop.permute.xlu1 %1393 }
 0x290   :  { %v1397_v43 = vsel %vm1184_vm11, %v1392_v48, %v1394_v61  ;;  %v1421_v9 = vsel %vm1210_vm12, %v2801_v8, %v1417_v58 }
 0x292   :  { %1670 = vmatpush1.bf16.msra.mxu1 %v1370_v40  ;;  %2027 = vmatpush1.bf16.msk.msra.mxu0 %vm2025_vm8, %v2985_v47 }
 0x293   :  { %v1467_v59 = vpop.permute.xlu0 %1466  ;;  %1739 = vmatprep.subr.bf16.mxu1 %v1397_v43  ;;  %v1419_v7 = vpop.permute.xlu1 %1418 }
 0x294   :  { %v1422_v38 = vsel %vm1210_vm12, %v1417_v58, %v1419_v7  ;;  %v1471_v18 = vsel %vm1262_vm14, %v2813_v10, %v1467_v59 }
 0x295   :  { %1686 = vmatmul.mubr.bf16.vlgmr.msra.gmra.mrb[8].mxu1 %v2873_v22 }
 0x296   :  { %1740 = vmatpush1.bf16.msra.mxu1 %v1396_v45  ;;  %2015 = vmatprep.mubr.msk.bf16.mxu1 %vm823_vm0, %v2687_v42  ;;  %v1446_v42 = vsel %vm1236_vm13, %v1440_v28, %v1442_v62 }
 0x297   :  { %v1496_v50 = vpop.permute.xlu0 %1495  ;;  %1741 = vmatprep.subr.bf16.mxu1 %v1422_v38  ;;  %v1544_v1 = vpop.permute.xlu1 %1543 }
 0x298   :  { %v1501_v0 = vsel %vm151_vm1, %v1494_v57, %v1496_v50 }
 0x299   :  { %1706 = vmatprep.subr.bf16.mxu0 %v1501_v0 }
 0x29a   :  { %1707 = vmatpush1.bf16.msra.mxu0 %v1296_v60  ;;  %1742 = vmatpush1.bf16.msra.mxu1 %v1421_v9 }
 0x29b   :  { %v1444_v39 = vpop.permute.xlu0 %1443  ;;  %v1469_v44 = vpop.permute.xlu1 %1468 }
 0x29c   :  { %v1447_v16 = vsel %vm1236_vm13, %v1442_v62, %v1444_v39  ;;  %v1472_v27 = vsel %vm1262_vm14, %v1467_v59, %v1469_v44 }
 0x29d   :  { %1743 = vmatprep.subr.bf16.mxu1 %v1447_v16 }
 0x29e   :  { %1744 = vmatpush1.bf16.msra.mxu1 %v1446_v42 }
 0x29f   :  { %v1521_v46 = vpop.permute.xlu0 %1520  ;;  %1745 = vmatprep.subr.bf16.mxu1 %v1472_v27  ;;  %v1569_v53 = vpop.permute.xlu1 %1568 }
 0x2a0   :  { %v1526_v8 = vsel %vm1319_vm7, %v1519_v55, %v1521_v46  ;;  %v2987_v55 = vpack.c.bf16 %v2635_v25, %v2628_v2 }
 0x2a1   :  { %1708 = vmatprep.subr.bf16.mxu0 %v1526_v8 }
 0x2a2   :  { %1746 = vmatpush1.bf16.msra.mxu1 %v1471_v18 }
 0x2a3   :  { %v2079_v57 = vpop.permute.xlu0 %2078  ;;  %2030 = vmatprep.subr.msk.bf16.mxu1 %vm2025_vm8, %v2986_v17  ;;  %v1498_v15 = vpop.permute.xlu1 %1497 }
 0x2a4   :  { %v2081_v28 = vunpack.i.h.bf16 %v2079_v57  ;;  %v1503_v37 = vsel %vm151_vm1, %v1498_v15, %v2075_v51  ;;  %v2080_v49 = vunpack.i.l.bf16 %v2079_v57  ;;  %v1502_v2 = vsel %vm151_vm1, %v1496_v50, %v1498_v15 }
 0x2a6   :  { %2033 = vmatpush1.bf16.msk.msra.mxu1 %vm2016_vm5, %v2987_v55  ;;  %v1322_v14 = vsel %vm1319_vm7, %v2767_v20, %v2081_v28 }
 0x2a7   :  { %v1546_v29 = vpop.permute.xlu0 %1545  ;;  %1709 = vmatpush1.bf16.msra.mxu0 %v1322_v14  ;;  %1749 = vmatprep.subr.bf16.mxu1 %v1503_v37  ;;  %v1523_v10 = vpop.permute.xlu1 %1522 }
 0x2a8   :  { %v1551_v41 = vsel %vm227_vm3, %v1544_v1, %v1546_v29  ;;  %v1528_v52 = vsel %vm1319_vm7, %v1523_v10, %v2080_v49  ;;  %v1527_v20 = vsel %vm1319_vm7, %v1521_v46, %v1523_v10 }
 0x2a9   :  { %1710 = vmatprep.subr.bf16.mxu0 %v1551_v41 }
 0x2aa   :  { %1750 = vmatpush1.bf16.msra.mxu1 %v1502_v2 }
 0x2ab   :  { %v2084_v25 = vpop.permute.xlu0 %2083  ;;  %1751 = vmatprep.subr.bf16.mxu1 %v1528_v52  ;;  %v1548_v19 = vpop.permute.xlu1 %1547 }
 0x2ac   :  { %v2086_v56 = vunpack.i.h.bf16 %v2084_v25  ;;  %v2085_v4 = vunpack.i.l.bf16 %v2084_v25  ;;  %v1552_v21 = vsel %vm227_vm3, %v1546_v29, %v1548_v19 }
 0x2ae   :  { %1752 = vmatpush1.bf16.msra.mxu1 %v1527_v20  ;;  %v1347_v36 = vsel %vm227_vm3, %v2773_v23, %v2086_v56  ;;  %v1553_v62 = vsel %vm227_vm3, %v1548_v19, %v2085_v4 }
 0x2af   :  { %v1571_v48 = vpop.permute.xlu0 %1570  ;;  %1711 = vmatpush1.bf16.msra.mxu0 %v1347_v36  ;;  %1753 = vmatprep.subr.bf16.mxu1 %v1553_v62  ;;  %v1573_v34 = vpop.permute.xlu1 %1572 }
 0x2b0   :  { %v1576_v63 = vsel %vm265_vm4, %v1569_v53, %v1571_v48  ;;  %v1577_v47 = vsel %vm265_vm4, %v1571_v48, %v1573_v34 }
 0x2b1   :  { %1712 = vmatprep.subr.bf16.mxu0 %v1576_v63 }
 0x2b2   :  { %1754 = vmatpush1.bf16.msra.mxu1 %v1552_v21 }
 0x2b3   :  { %v2089_v26 = vpop.permute.xlu0 %2088 }
 0x2b4   :  { %v2091_v58 = vunpack.i.h.bf16 %v2089_v26  ;;  %v2090_v61 = vunpack.i.l.bf16 %v2089_v26 }
 0x2b6   :  { %v1372_v40 = vsel %vm265_vm4, %v2775_v24, %v2091_v58  ;;  %v1578_v23 = vsel %vm265_vm4, %v1573_v34, %v2090_v61 }
 0x2b7   :  { %1713 = vmatpush1.bf16.msra.mxu0 %v1372_v40  ;;  %1755 = vmatprep.subr.bf16.mxu1 %v1578_v23 }
 0x2b8   :  { %1756 = vmatpush1.bf16.msra.mxu1 %v1577_v47 }
 0x2ba   :  { %1729 = vmatmul.mubr.bf16.vlgmr.msra.gmra.mrb[16].mxu0 %v2873_v22 }
 0x2bb   :  { %1772 = vmatmul.mubr.bf16.vlgmr.msra.gmra.mrb[12].mxu1 %v2873_v22 }
 0x2c0   :  { %v1787_v43 = vpop.permute.xlu1 %1786 }
 0x2c4   :  { %v1792_v45 = vpop.permute.xlu0 %1791  ;;  %v1853_v16 = vpop.permute.xlu1 %1852 }
 0x2c8   :  { %v1858_v22 = vpop.permute.xlu0 %1857  ;;  %v2937_v27 = vpop.permute.xlu1 %1061 }
 0x2c9   :  { %v1069_v28 = vadd.f32 %v2937_v27, %v2523_v30  ;;  %v1070_v29 = vadd.f32 %v2937_v27, %v2525_v31 }
 0x2cc   :  { %v1067_v57 = vpop.permute.xlu0 %1066 }
 0x2cd   :  { %v1072_v2 = vadd.f32 %v1067_v57, %v2527_v33  ;;  %v1073_v56 = vadd.f32 %v1067_v57, %v2529_v35 }
 0x368   :  { %v1687_v59 = vpop.f32.mrb[8].mxu1 }
 0x369   :  { %v1794_v7 = vadd.f32 %v1787_v43, %v1687_v59  ;;  %v1689_v32 = vpop.f32.mrb[9].mxu1 }
 0x36a   :  { %v1795_v38 = vadd.f32 %v1787_v43, %v1689_v32  ;;  %v1691_v50 = vpop.f32.mrb[10].mxu1 }
 0x36b   :  { %v1806_v1 = vmul.f32 0.70710677, %v1794_v7  ;;  %v1797_v24 = vadd.f32 %v1792_v45, %v1691_v50  ;;  %v1693_v0 = vpop.f32.mrb[11].mxu1  ;;  %v1800_v53 = vmul.f32 0.5, %v1794_v7 }
 0x36c   :  { %v1807_v9 = vmul.f32 0.70710677, %v1795_v38  ;;  %v1798_v60 = vadd.f32 %v1792_v45, %v1693_v0  ;;  %v1801_v17 = vmul.f32 0.5, %v1795_v38 }
 0x36d   :  { %2139 = verf.f32 %v1806_v1  ;;  %v1809_v39 = vmul.f32 0.70710677, %v1797_v24  ;;  %v1803_v14 = vmul.f32 0.5, %v1797_v24 }
 0x36e   :  { %2141 = verf.f32 %v1807_v9  ;;  %v1810_v44 = vmul.f32 0.70710677, %v1798_v60  ;;  %v1804_v49 = vmul.f32 0.5, %v1798_v60 }
 0x36f   :  { %2143 = verf.f32 %v1809_v39  ;;  %v1071_v39 = vadd.f32 %v2937_v27, %v2739_v54 }
 0x370   :  { %2145 = verf.f32 %v1810_v44  ;;  %v1074_v44 = vadd.f32 %v1067_v57, %v2753_v6 }
 0x377   :  { %v2140_v42 = vpop.eup %2139 }
 0x378   :  { %v2142_v46 = vpop.eup %2141  ;;  %v1818_v8 = vadd.f32 1.0, %v2140_v42 }
 0x379   :  { %v2144_v18 = vpop.eup %2143  ;;  %v1819_v15 = vadd.f32 1.0, %v2142_v46 }
 0x37a   :  { %v2146_v51 = vpop.eup %2145  ;;  %v1824_v55 = vmul.f32 %v1818_v8, %v1800_v53  ;;  %v1821_v37 = vadd.f32 1.0, %v2144_v18 }
 0x37b   :  { %v1825_v10 = vmul.f32 %v1819_v15, %v1801_v17  ;;  %v1822_v41 = vadd.f32 1.0, %v2146_v51 }
 0x37c   :  { %v1836_v52 = vadd.f32 %v1824_v55, %v1069_v28  ;;  %v1827_v25 = vmul.f32 %v1821_v37, %v1803_v14 }
 0x37d   :  { %v1837_v4 = vadd.f32 %v1825_v10, %v1070_v29  ;;  %v1828_v20 = vmul.f32 %v1822_v41, %v1804_v49 }
 0x37e   :  { %1842 = vst [vmem:[#allocation7] sm:$0xff] %v1836_v52  ;;  %v1839_v19 = vadd.f32 %v1827_v25, %v1072_v2 }
 0x37f   :  { %1843 = vst [vmem:[#allocation7 + $0x8] sm:$0xff] %v1837_v4  ;;  %v1840_v30 = vadd.f32 %v1828_v20, %v1073_v56 }
 0x380   :  { %1845 = vst [vmem:[#allocation7 + $0x18] sm:$0xff] %v1839_v19 }
 0x381   :  { %1846 = vst [vmem:[#allocation7 + $0x20] sm:$0xff] %v1840_v30 }
 0x38d   :  { %v1730_v36 = vpop.f32.mrb[16].mxu0 }
 0x38e   :  { %v1796_v62 = vadd.f32 %v1787_v43, %v1730_v36  ;;  %v1732_v31 = vpop.f32.mrb[17].mxu0  ;;  %v1773_v48 = vpop.f32.mrb[12].mxu1 }
 0x38f   :  { %v1860_v63 = vadd.f32 %v1853_v16, %v1732_v31  ;;  %v1861_v21 = vadd.f32 %v1853_v16, %v1773_v48  ;;  %v1734_v26 = vpop.f32.mrb[18].mxu0  ;;  %v1775_v33 = vpop.f32.mrb[13].mxu1 }
 0x390   :  { %v1808_v34 = vmul.f32 0.70710677, %v1796_v62  ;;  %v1799_v58 = vadd.f32 %v1792_v45, %v1734_v26  ;;  %v1862_v61 = vadd.f32 %v1853_v16, %v1775_v33  ;;  %v1736_v35 = vpop.f32.mrb[19].mxu0  ;;  %v1777_v40 = vpop.f32.mrb[14].mxu1  ;;  %v1802_v42 = vmul.f32 0.5, %v1796_v62  ;;  %v2988_v26 = vld [vmem:[#allocation10_spill] sm:$0xff] }
 0x391   :  { %v1872_v23 = vmul.f32 0.70710677, %v1860_v63  ;;  %v1873_v47 = vmul.f32 0.70710677, %v1861_v21  ;;  %v1779_v7 = vpop.f32.mrb[15].mxu1  ;;  %v1863_v38 = vadd.f32 %v1858_v22, %v1736_v35  ;;  %v1864_v43 = vadd.f32 %v1858_v22, %v1777_v40  ;;  %v1148_v45 = vpop.permute.xlu1 %1147 }
 0x392   :  { %2147 = verf.f32 %v1808_v34  ;;  %v1811_v59 = vmul.f32 0.70710677, %v1799_v58  ;;  %v1874_v32 = vmul.f32 0.70710677, %v1862_v61  ;;  %v1865_v50 = vadd.f32 %v1858_v22, %v1779_v7  ;;  %v1153_v16 = vpop.permute.xlu0 %1152 }
 0x393   :  { %2149 = verf.f32 %v1872_v23  ;;  %v1875_v1 = vmul.f32 0.70710677, %v1863_v38  ;;  %v1876_v24 = vmul.f32 0.70710677, %v1864_v43  ;;  %v1155_v53 = vadd.f32 %v1148_v45, %v2746_v3 }
 0x394   :  { %2151 = verf.f32 %v1873_v47  ;;  %v1877_v0 = vmul.f32 0.70710677, %v1865_v50  ;;  %v1156_v8 = vadd.f32 %v1148_v45, %v2748_v13  ;;  %v1866_v18 = vmul.f32 0.5, %v1860_v63 }
 0x395   :  { %2153 = verf.f32 %v1811_v59  ;;  %v1157_v51 = vadd.f32 %v1148_v45, %v2755_v11  ;;  %v1867_v55 = vmul.f32 0.5, %v1861_v21  ;;  %v1158_v54 = vadd.f32 %v1153_v16, %v2757_v12 }
 0x396   :  { %2155 = verf.f32 %v1874_v32  ;;  %v1805_v27 = vmul.f32 0.5, %v1799_v58  ;;  %v1868_v3 = vmul.f32 0.5, %v1862_v61  ;;  %v1869_v25 = vmul.f32 0.5, %v1863_v38 }
 0x397   :  { %2157 = verf.f32 %v1875_v1  ;;  %v1870_v19 = vmul.f32 0.5, %v1864_v43  ;;  %v1871_v62 = vmul.f32 0.5, %v1865_v50  ;;  %v1159_v48 = vadd.f32 %v1153_v16, %v2759_v5 }
 0x398   :  { %2159 = verf.f32 %v1876_v24  ;;  %v1160_v33 = vadd.f32 %v1153_v16, %v2988_v26 }
 0x399   :  { %2161 = verf.f32 %v1877_v0 }
 0x39c   :  { %v2148_v9 = vpop.eup %2147 }
 0x39d   :  { %v2150_v60 = vpop.eup %2149  ;;  %v1820_v46 = vadd.f32 1.0, %v2148_v9 }
 0x39e   :  { %v2152_v22 = vpop.eup %2151  ;;  %v1884_v17 = vadd.f32 1.0, %v2150_v60 }
 0x39f   :  { %v2154_v15 = vpop.eup %2153  ;;  %v1826_v28 = vmul.f32 %v1820_v46, %v1802_v42  ;;  %v1885_v14 = vadd.f32 1.0, %v2152_v22 }
 0x3a0   :  { %v2156_v37 = vpop.eup %2155  ;;  %v1890_v6 = vmul.f32 %v1884_v17, %v1866_v18  ;;  %v1823_v57 = vadd.f32 1.0, %v2154_v15 }
 0x3a1   :  { %v2158_v29 = vpop.eup %2157  ;;  %v1838_v10 = vadd.f32 %v1826_v28, %v1071_v39  ;;  %v1891_v49 = vmul.f32 %v1885_v14, %v1867_v55  ;;  %v1886_v41 = vadd.f32 1.0, %v2156_v37 }
 0x3a2   :  { %v2160_v13 = vpop.eup %2159  ;;  %v1902_v2 = vadd.f32 %v1890_v6, %v1155_v53  ;;  %v1829_v52 = vmul.f32 %v1823_v57, %v1805_v27  ;;  %v1887_v56 = vadd.f32 1.0, %v2158_v29 }
 0x3a3   :  { %v2162_v11 = vpop.eup %2161  ;;  %1844 = vst [vmem:[#allocation7 + $0x10] sm:$0xff] %v1838_v10  ;;  %v1903_v4 = vadd.f32 %v1891_v49, %v1156_v8  ;;  %v1892_v20 = vmul.f32 %v1886_v41, %v1868_v3  ;;  %v1888_v30 = vadd.f32 1.0, %v2160_v13 }
 0x3a4   :  { %1908 = vst [vmem:[#allocation7 + $0x30] sm:$0xff] %v1902_v2  ;;  %v1841_v12 = vadd.f32 %v1829_v52, %v1074_v44  ;;  %v1893_v36 = vmul.f32 %v1887_v56, %v1869_v25  ;;  %v1889_v31 = vadd.f32 1.0, %v2162_v11 }
 0x3a5   :  { %1909 = vst [vmem:[#allocation7 + $0x38] sm:$0xff] %v1903_v4  ;;  %v1904_v63 = vadd.f32 %v1892_v20, %v1157_v51  ;;  %v1894_v21 = vmul.f32 %v1888_v30, %v1870_v19 }
 0x3a6   :  { %1847 = vst [vmem:[#allocation7 + $0x28] sm:$0xff] %v1841_v12  ;;  %v1905_v34 = vadd.f32 %v1893_v36, %v1158_v54  ;;  %v1895_v58 = vmul.f32 %v1889_v31, %v1871_v62 }
 0x3a7   :  { %1910 = vst [vmem:[#allocation7 + $0x40] sm:$0xff] %v1904_v63  ;;  %v1906_v61 = vadd.f32 %v1894_v21, %v1159_v48 }
 0x3a8   :  { %1911 = vst [vmem:[#allocation7 + $0x48] sm:$0xff] %v1905_v34  ;;  %v1907_v35 = vadd.f32 %v1895_v58, %v1160_v33 }
 0x3a9   :  { %1912 = vst [vmem:[#allocation7 + $0x50] sm:$0xff] %v1906_v61 }
 0x3aa   :  { %1913 = vst [vmem:[#allocation7 + $0x58] sm:$0xff] %v1907_v35 }
 0x3ab   :  { %2196 = shalt.err (!%p2193_p12)
}
 0x3ac   :  { %s2197_s22 = scalar_lea.hbm %s2972_s6, 1536 }
 0x3ad   :  { %p2198_p13 = scmp.ne.s32.totalorder %s2972_s6, %s2197_s22  ;;  %p2201_p0 = scmp.lt.u32.totalorder %s2197_s22, %s2972_s6 }
 0x3af   :  { %p2203_p1 = pnand %p2201_p0, %p2198_p13 }
 0x3b1   :  { %2206 = shalt.err (!%p2203_p1)
}
 0x3b2   :  { %s2229_s26 = smov 384   ;;  %s2230_s27 = smov 24  }
 0x3b3   :  { %1925 = dma.vmem_to_hbm [thread:$0]  %s1920_s18, 1536, %s2972_s6, [#allocation6], %s2229_s26, %s2229_s26, %s2230_s27  }
 0x3b4   :  { %2209 = dma.done.wait [#allocation6], 1536  }
 0x3b5   :  { %2210 = vsyncadd [#allocation6], 4294965760 }
 0x3b6   :  { %1929 = vsyncpa [#allocation5], 1 }
 0x3b7   :  { %1930 = vsyncpa [#allocation6], 1 }

</bundles_post_ra>
